<compile_context>
chip_gen: v6e
topology: v6e:2x2x1
jax: 0.10.0
libtpu: 0.0.40
codegen_flags: <defaults>
</compile_context>

<pallas_src>
import functools

import jax
import jax.numpy as jnp
from jax.experimental import pallas as pl
from jax.experimental.pallas import tpu as pltpu

VOCAB = 17  # nt_vocab_size in the PyTorch module


# ------------------------------ fused kernel --------------------------------
def make_fused_rnn_kernel(T, BB, H, num_layers, out_size):
    H2 = 2 * H

    def kernel(*refs):
        xp0_ref = refs[0]                          # (T, BB, 2H) layer-0 x-proj (+bias); bwd half pre-reversed
        whh0_ref = refs[1]                         # (2H, 2H) block-diag layer-0 hidden weights
        lrefs = refs[2:2 + 3 * (num_layers - 1)]   # per layer>=1: W_ih (2H,2H), W_hh blockdiag (2H,2H), bias (1,2H)
        wout_ref = refs[2 + 3 * (num_layers - 1)]  # (2H, out)
        bout_ref = refs[3 + 3 * (num_layers - 1)]  # (1, out)
        out_ref = refs[4 + 3 * (num_layers - 1)]   # (BB, out)
        hs_ref = refs[5 + 3 * (num_layers - 1)]    # VMEM scratch (T, BB, 2H): layer outputs, step order
        xp_ref = refs[6 + 3 * (num_layers - 1)]    # VMEM scratch (T, BB, 2H): next-layer inputs, step order

        # Lane mask selecting the forward-direction half (lanes [0, H)).
        # Only used at layer boundaries -- the serial loops are select-free.
        lane = jax.lax.broadcasted_iota(jnp.int32, (BB, H2), 1)
        fwd_mask = lane < H

        def run_layer(xin_ref, whh, store_hs):
            # Serial recurrence.  xin_ref[s] already holds
            #   [fwd-dir input @ time s | bwd-dir input @ time T-1-s] (bias folded),
            # so each step is exactly one MXU dot (K = 2H) + one tanh.
            h = jnp.tanh(xin_ref[0])               # h_0 = 0 (PyTorch default) -> skip first dot
            if store_hs:
                hs_ref[0] = h                      # stores sit in the vst slot, off the chain
            for s in range(1, T):                  # T is small & static: unrolled
                h = jnp.tanh(jnp.dot(h, whh, preferred_element_type=jnp.float32)
                             + xin_ref[s])
                if store_hs:
                    hs_ref[s] = h
            return h

        # ---------------- layer 0 ------------------------------------------------
        h = run_layer(xp0_ref, whh0_ref[...], num_layers > 1)

        # ---------------- layers 1 .. L-1 ----------------------------------------
        for li in range(num_layers - 1):
            wih = lrefs[3 * li][...]                                    # hoisted weight loads
            whh = lrefs[3 * li + 1][...]
            b = jnp.broadcast_to(lrefs[3 * li + 2][...], (BB, H2))      # hoisted bias broadcast
            # Layer boundary (off the critical path): previous layer outputs are
            # stored step-ordered as hs_ref[s] = [fwd(s) | bwd(T-1-s)].
            #   prev_out(t)        = [fwd(t)       | bwd(t)]
            #   xp_ref[s] (wanted) = [P_f(s) + b_f | P_b(T-1-s) + b_b]
            for t in range(T):
                pout_t = jnp.where(fwd_mask, hs_ref[t], hs_ref[T - 1 - t])
                p = jnp.dot(pout_t, wih, preferred_element_type=jnp.float32) + b
                xp_ref[t, :, :H] = p[:, :H]            # fwd projection @ step t
                xp_ref[T - 1 - t, :, H:] = p[:, H:]    # bwd projection @ step T-1-t
            h = run_layer(xp_ref, whh, li < num_layers - 2)

        # ---------------- head: Linear + Softmax / Sigmoid ------------------------
        # h == [fwd hidden after t=T-1 | bwd hidden after t=0] of the LAST layer,
        # i.e. torch's h_n.view(L, 2, B, H)[-1] concatenated along the feature dim.
        logits = (jnp.dot(h, wout_ref[...], preferred_element_type=jnp.float32)
                  + bout_ref[...])
        if out_size != 1:                                    # nn.Softmax(dim=-1)
            m = jnp.max(logits, axis=-1, keepdims=True)
            e = jnp.exp(logits - m)
            inv = pl.reciprocal(jnp.sum(e, axis=-1, keepdims=True), approx=True)
            out_ref[...] = (e * inv).astype(out_ref.dtype)
        else:                                                # nn.Sigmoid()
            out_ref[...] = pl.reciprocal(1.0 + jnp.exp(-logits),
                                         approx=True).astype(out_ref.dtype)

    return kernel


# ------------------------------ weight packing -------------------------------
def _block_diag2(a, b):
    """[[a, 0], [0, b]] for 2-D a, b."""
    za = jnp.zeros((a.shape[0], b.shape[1]), a.dtype)
    zb = jnp.zeros((b.shape[0], a.shape[1]), a.dtype)
    return jnp.concatenate([jnp.concatenate([a, za], axis=1),
                            jnp.concatenate([zb, b], axis=1)], axis=0)


@functools.partial(jax.jit, static_argnums=(2, 3))
def rnn_forward(tokens, params, num_layers, out_size):
    """tokens: (B, T) int32.  Mirrors RNN.forward of the PyTorch module."""
    B, T = tokens.shape
    H = params["l0_fwd"]["w_hh"].shape[0]
    H2 = 2 * H

    # Layer-0 input projection as a row gather (replaces one-hot + K=17 matmul)
    # with the layer-0 biases (b_ih + b_hh) folded in.  The backward half is built
    # from the TIME-REVERSED token stream so the kernel just reads xp0[s].
    tok_t = tokens.T                                                     # (T, B)
    xf = params["l0_fwd"]["w_ih"][tok_t] + params["l0_fwd"]["b"]         # fwd input @ time s
    xb = params["l0_bwd"]["w_ih"][tok_t[::-1]] + params["l0_bwd"]["b"]   # bwd input @ time T-1-s
    xp0 = jnp.concatenate([xf, xb], axis=-1).astype(jnp.float32)         # (T, B, 2H)

    whh0 = _block_diag2(params["l0_fwd"]["w_hh"], params["l0_bwd"]["w_hh"])

    args = [xp0, whh0]
    for l in range(1, num_layers):
        pf, pb = params[f"l{l}_fwd"], params[f"l{l}_bwd"]
        wih = jnp.concatenate([pf["w_ih"], pb["w_ih"]], axis=1)          # (2H, 2H) dense
        whh = _block_diag2(pf["w_hh"], pb["w_hh"])                       # (2H, 2H)
        b = jnp.concatenate([pf["b"], pb["b"]], axis=1)                  # (1, 2H)
        args += [wih, whh, b]
    args += [params["out_w"], params["out_b"]]

    # Batch tiling: 8 sublanes per tile; grid axis is "parallel" (megacore on v7x).
    BB = 8 if B % 8 == 0 else B
    grid = (B // BB,)

    const2 = lambda i: (0, 0)
    in_specs = [pl.BlockSpec((T, BB, H2), lambda i: (0, i, 0)),
                pl.BlockSpec((H2, H2), const2)]
    for _ in range(num_layers - 1):
        in_specs += [pl.BlockSpec((H2, H2), const2),
                     pl.BlockSpec((H2, H2), const2),
                     pl.BlockSpec((1, H2), const2)]
    in_specs += [pl.BlockSpec((H2, out_size), const2),
                 pl.BlockSpec((1, out_size), const2)]

    kernel = make_fused_rnn_kernel(T, BB, H, num_layers, out_size)
    return pl.pallas_call(
        kernel,
        grid=grid,
        in_specs=in_specs,
        out_specs=pl.BlockSpec((BB, out_size), lambda i: (i, 0)),
        out_shape=jax.ShapeDtypeStruct((B, out_size), jnp.float32),
        scratch_shapes=[pltpu.VMEM((T, BB, H2), jnp.float32),   # layer outputs (step order)
                        pltpu.VMEM((T, BB, H2), jnp.float32)],  # next-layer inputs (step order)
        compiler_params=pltpu.CompilerParams(
            dimension_semantics=("parallel",),
            vmem_limit_bytes=32 * 1024 * 1024),
    )(*args)


# ----------------------------------- main ------------------------------------
if __name__ == "__main__":
    # batch (multiple of 8 per perf review), seq_len, hidden_size, n_hid_lyrs, output_size
    B, T, H, L, OUT = 16, 8, 32, 2, 4

    key = jax.random.PRNGKey(0)
    keys = iter(jax.random.split(key, 64))
    scale = 1.0 / float(H) ** 0.5

    def u(shape):
        return jax.random.uniform(next(keys), shape, jnp.float32, -scale, scale)

    params = {}
    for l in range(L):
        in_size = VOCAB if l == 0 else 2 * H
        for d in ("fwd", "bwd"):
            params[f"l{l}_{d}"] = {
                "w_ih": u((in_size, H)),   # stored transposed vs PyTorch (H, in)
                "w_hh": u((H, H)),
                "b":    u((1, H)),         # b_ih + b_hh pre-combined
            }
    params["out_w"] = u((2 * H, OUT))      # transposed vs PyTorch Linear weight
    params["out_b"] = u((1, OUT))

    tokens = jax.random.randint(next(keys), (B, T), 0, VOCAB, dtype=jnp.int32)

    out = rnn_forward(tokens, params, L, OUT)
    jax.block_until_ready(out)
    assert out.shape == (B, OUT), out.shape
    assert bool(jnp.all(jnp.isfinite(out)))
    print("KERNEL_OK")
</pallas_src>

<mosaic_0001>
module attributes {stable_mosaic.version = 11 : i64} {
  func.func @kernel(%arg0: i32, %arg1: memref<8x8x64xf32, #tpu.memory_space<vmem>>, %arg2: memref<64x64xf32, #tpu.memory_space<vmem>>, %arg3: memref<64x64xf32, #tpu.memory_space<vmem>>, %arg4: memref<64x64xf32, #tpu.memory_space<vmem>>, %arg5: memref<1x64xf32, #tpu.memory_space<vmem>>, %arg6: memref<64x4xf32, #tpu.memory_space<vmem>>, %arg7: memref<1x4xf32, #tpu.memory_space<vmem>>, %arg8: memref<8x4xf32, #tpu.memory_space<vmem>>, %arg9: memref<8x8x64xf32, #tpu.memory_space<vmem>>, %arg10: memref<8x8x64xf32, #tpu.memory_space<vmem>>) attributes {dimension_semantics = [#tpu.dimension_semantics<parallel>], iteration_bounds = array<i64: 2>, scalar_prefetch = 0 : i64, scratch_operands = 2 : i64, tpu.core_type = #tpu.core_type<tc>, window_params = [{transform_indices = @transform_0, window_bounds = array<i64: 8, 8, 64>}, {pipeline_mode = #tpu.pipeline_mode<synchronous>, transform_indices = @transform_1, window_bounds = array<i64: 64, 64>}, {pipeline_mode = #tpu.pipeline_mode<synchronous>, transform_indices = @transform_2, window_bounds = array<i64: 64, 64>}, {pipeline_mode = #tpu.pipeline_mode<synchronous>, transform_indices = @transform_3, window_bounds = array<i64: 64, 64>}, {pipeline_mode = #tpu.pipeline_mode<synchronous>, transform_indices = @transform_4, window_bounds = array<i64: 1, 64>}, {pipeline_mode = #tpu.pipeline_mode<synchronous>, transform_indices = @transform_5, window_bounds = array<i64: 64, 4>}, {pipeline_mode = #tpu.pipeline_mode<synchronous>, transform_indices = @transform_6, window_bounds = array<i64: 1, 4>}, {transform_indices = @transform_7, window_bounds = array<i64: 8, 4>}]} {
    %0 = tpu.iota {dimensions = array<i32: 1>} : vector<8x64xi32>
    %c32_i32 = arith.constant 32 : i32
    %1 = vector.broadcast %c32_i32 : i32 to vector<8x64xi32>
    %2 = arith.cmpi slt, %0, %1 : vector<8x64xi32>
    %c0 = arith.constant 0 : index
    %c0_0 = arith.constant 0 : index
    %3 = vector.load %arg2[%c0, %c0_0] : memref<64x64xf32, #tpu.memory_space<vmem>>, vector<64x64xf32>
    %c0_1 = arith.constant 0 : index
    %c0_2 = arith.constant 0 : index
    %c0_3 = arith.constant 0 : index
    %4 = vector.load %arg1[%c0_1, %c0_2, %c0_3] : memref<8x8x64xf32, #tpu.memory_space<vmem>>, vector<1x8x64xf32>
    %5 = vector.shape_cast %4 : vector<1x8x64xf32> to vector<8x64xf32>
    %6 = math.tanh %5 : vector<8x64xf32>
    %c0_4 = arith.constant 0 : index
    %c0_5 = arith.constant 0 : index
    %c0_6 = arith.constant 0 : index
    %7 = vector.load %arg9[%c0_4, %c0_5, %c0_6] : memref<8x8x64xf32, #tpu.memory_space<vmem>>, vector<1x8x64xf32>
    %8 = vector.shape_cast %7 : vector<1x8x64xf32> to vector<8x64xf32>
    %9 = vector.shape_cast %6 : vector<8x64xf32> to vector<1x8x64xf32>
    tpu.vector_store %arg9[%c0_4, %c0_5, %c0_6], %9 {strides = array<i32>} : memref<8x8x64xf32, #tpu.memory_space<vmem>>, vector<1x8x64xf32>,
    %cst = arith.constant dense<0.000000e+00> : vector<8x64xf32>
    %10 = tpu.matmul %6, %3, %cst {dimension_numbers = #tpu.dot_dimension_numbers<[1], [0], [0], [1], [0, 0, 1, 1], [], []>} : vector<8x64xf32>, vector<64x64xf32>, vector<8x64xf32> -> vector<8x64xf32>
    %c1 = arith.constant 1 : index
    %c0_7 = arith.constant 0 : index
    %c0_8 = arith.constant 0 : index
    %11 = vector.load %arg1[%c1, %c0_7, %c0_8] : memref<8x8x64xf32, #tpu.memory_space<vmem>>, vector<1x8x64xf32>
    %12 = vector.shape_cast %11 : vector<1x8x64xf32> to vector<8x64xf32>
    %13 = arith.addf %10, %12 : vector<8x64xf32>
    %14 = math.tanh %13 : vector<8x64xf32>
    %c1_9 = arith.constant 1 : index
    %c0_10 = arith.constant 0 : index
    %c0_11 = arith.constant 0 : index
    %15 = vector.load %arg9[%c1_9, %c0_10, %c0_11] : memref<8x8x64xf32, #tpu.memory_space<vmem>>, vector<1x8x64xf32>
    %16 = vector.shape_cast %15 : vector<1x8x64xf32> to vector<8x64xf32>
    %17 = vector.shape_cast %14 : vector<8x64xf32> to vector<1x8x64xf32>
    tpu.vector_store %arg9[%c1_9, %c0_10, %c0_11], %17 {strides = array<i32>} : memref<8x8x64xf32, #tpu.memory_space<vmem>>, vector<1x8x64xf32>,
    %cst_12 = arith.constant dense<0.000000e+00> : vector<8x64xf32>
    %18 = tpu.matmul %14, %3, %cst_12 {dimension_numbers = #tpu.dot_dimension_numbers<[1], [0], [0], [1], [0, 0, 1, 1], [], []>} : vector<8x64xf32>, vector<64x64xf32>, vector<8x64xf32> -> vector<8x64xf32>
    %c2 = arith.constant 2 : index
    %c0_13 = arith.constant 0 : index
    %c0_14 = arith.constant 0 : index
    %19 = vector.load %arg1[%c2, %c0_13, %c0_14] : memref<8x8x64xf32, #tpu.memory_space<vmem>>, vector<1x8x64xf32>
    %20 = vector.shape_cast %19 : vector<1x8x64xf32> to vector<8x64xf32>
    %21 = arith.addf %18, %20 : vector<8x64xf32>
    %22 = math.tanh %21 : vector<8x64xf32>
    %c2_15 = arith.constant 2 : index
    %c0_16 = arith.constant 0 : index
    %c0_17 = arith.constant 0 : index
    %23 = vector.load %arg9[%c2_15, %c0_16, %c0_17] : memref<8x8x64xf32, #tpu.memory_space<vmem>>, vector<1x8x64xf32>
    %24 = vector.shape_cast %23 : vector<1x8x64xf32> to vector<8x64xf32>
    %25 = vector.shape_cast %22 : vector<8x64xf32> to vector<1x8x64xf32>
    tpu.vector_store %arg9[%c2_15, %c0_16, %c0_17], %25 {strides = array<i32>} : memref<8x8x64xf32, #tpu.memory_space<vmem>>, vector<1x8x64xf32>,
    %cst_18 = arith.constant dense<0.000000e+00> : vector<8x64xf32>
    %26 = tpu.matmul %22, %3, %cst_18 {dimension_numbers = #tpu.dot_dimension_numbers<[1], [0], [0], [1], [0, 0, 1, 1], [], []>} : vector<8x64xf32>, vector<64x64xf32>, vector<8x64xf32> -> vector<8x64xf32>
    %c3 = arith.constant 3 : index
    %c0_19 = arith.constant 0 : index
    %c0_20 = arith.constant 0 : index
    %27 = vector.load %arg1[%c3, %c0_19, %c0_20] : memref<8x8x64xf32, #tpu.memory_space<vmem>>, vector<1x8x64xf32>
    %28 = vector.shape_cast %27 : vector<1x8x64xf32> to vector<8x64xf32>
    %29 = arith.addf %26, %28 : vector<8x64xf32>
    %30 = math.tanh %29 : vector<8x64xf32>
    %c3_21 = arith.constant 3 : index
    %c0_22 = arith.constant 0 : index
    %c0_23 = arith.constant 0 : index
    %31 = vector.load %arg9[%c3_21, %c0_22, %c0_23] : memref<8x8x64xf32, #tpu.memory_space<vmem>>, vector<1x8x64xf32>
    %32 = vector.shape_cast %31 : vector<1x8x64xf32> to vector<8x64xf32>
    %33 = vector.shape_cast %30 : vector<8x64xf32> to vector<1x8x64xf32>
    tpu.vector_store %arg9[%c3_21, %c0_22, %c0_23], %33 {strides = array<i32>} : memref<8x8x64xf32, #tpu.memory_space<vmem>>, vector<1x8x64xf32>,
    %cst_24 = arith.constant dense<0.000000e+00> : vector<8x64xf32>
    %34 = tpu.matmul %30, %3, %cst_24 {dimension_numbers = #tpu.dot_dimension_numbers<[1], [0], [0], [1], [0, 0, 1, 1], [], []>} : vector<8x64xf32>, vector<64x64xf32>, vector<8x64xf32> -> vector<8x64xf32>
    %c4 = arith.constant 4 : index
    %c0_25 = arith.constant 0 : index
    %c0_26 = arith.constant 0 : index
    %35 = vector.load %arg1[%c4, %c0_25, %c0_26] : memref<8x8x64xf32, #tpu.memory_space<vmem>>, vector<1x8x64xf32>
    %36 = vector.shape_cast %35 : vector<1x8x64xf32> to vector<8x64xf32>
    %37 = arith.addf %34, %36 : vector<8x64xf32>
    %38 = math.tanh %37 : vector<8x64xf32>
    %c4_27 = arith.constant 4 : index
    %c0_28 = arith.constant 0 : index
    %c0_29 = arith.constant 0 : index
    %39 = vector.load %arg9[%c4_27, %c0_28, %c0_29] : memref<8x8x64xf32, #tpu.memory_space<vmem>>, vector<1x8x64xf32>
    %40 = vector.shape_cast %39 : vector<1x8x64xf32> to vector<8x64xf32>
    %41 = vector.shape_cast %38 : vector<8x64xf32> to vector<1x8x64xf32>
    tpu.vector_store %arg9[%c4_27, %c0_28, %c0_29], %41 {strides = array<i32>} : memref<8x8x64xf32, #tpu.memory_space<vmem>>, vector<1x8x64xf32>,
    %cst_30 = arith.constant dense<0.000000e+00> : vector<8x64xf32>
    %42 = tpu.matmul %38, %3, %cst_30 {dimension_numbers = #tpu.dot_dimension_numbers<[1], [0], [0], [1], [0, 0, 1, 1], [], []>} : vector<8x64xf32>, vector<64x64xf32>, vector<8x64xf32> -> vector<8x64xf32>
    %c5 = arith.constant 5 : index
    %c0_31 = arith.constant 0 : index
    %c0_32 = arith.constant 0 : index
    %43 = vector.load %arg1[%c5, %c0_31, %c0_32] : memref<8x8x64xf32, #tpu.memory_space<vmem>>, vector<1x8x64xf32>
    %44 = vector.shape_cast %43 : vector<1x8x64xf32> to vector<8x64xf32>
    %45 = arith.addf %42, %44 : vector<8x64xf32>
    %46 = math.tanh %45 : vector<8x64xf32>
    %c5_33 = arith.constant 5 : index
    %c0_34 = arith.constant 0 : index
    %c0_35 = arith.constant 0 : index
    %47 = vector.load %arg9[%c5_33, %c0_34, %c0_35] : memref<8x8x64xf32, #tpu.memory_space<vmem>>, vector<1x8x64xf32>
    %48 = vector.shape_cast %47 : vector<1x8x64xf32> to vector<8x64xf32>
    %49 = vector.shape_cast %46 : vector<8x64xf32> to vector<1x8x64xf32>
    tpu.vector_store %arg9[%c5_33, %c0_34, %c0_35], %49 {strides = array<i32>} : memref<8x8x64xf32, #tpu.memory_space<vmem>>, vector<1x8x64xf32>,
    %cst_36 = arith.constant dense<0.000000e+00> : vector<8x64xf32>
    %50 = tpu.matmul %46, %3, %cst_36 {dimension_numbers = #tpu.dot_dimension_numbers<[1], [0], [0], [1], [0, 0, 1, 1], [], []>} : vector<8x64xf32>, vector<64x64xf32>, vector<8x64xf32> -> vector<8x64xf32>
    %c6 = arith.constant 6 : index
    %c0_37 = arith.constant 0 : index
    %c0_38 = arith.constant 0 : index
    %51 = vector.load %arg1[%c6, %c0_37, %c0_38] : memref<8x8x64xf32, #tpu.memory_space<vmem>>, vector<1x8x64xf32>
    %52 = vector.shape_cast %51 : vector<1x8x64xf32> to vector<8x64xf32>
    %53 = arith.addf %50, %52 : vector<8x64xf32>
    %54 = math.tanh %53 : vector<8x64xf32>
    %c6_39 = arith.constant 6 : index
    %c0_40 = arith.constant 0 : index
    %c0_41 = arith.constant 0 : index
    %55 = vector.load %arg9[%c6_39, %c0_40, %c0_41] : memref<8x8x64xf32, #tpu.memory_space<vmem>>, vector<1x8x64xf32>
    %56 = vector.shape_cast %55 : vector<1x8x64xf32> to vector<8x64xf32>
    %57 = vector.shape_cast %54 : vector<8x64xf32> to vector<1x8x64xf32>
    tpu.vector_store %arg9[%c6_39, %c0_40, %c0_41], %57 {strides = array<i32>} : memref<8x8x64xf32, #tpu.memory_space<vmem>>, vector<1x8x64xf32>,
    %cst_42 = arith.constant dense<0.000000e+00> : vector<8x64xf32>
    %58 = tpu.matmul %54, %3, %cst_42 {dimension_numbers = #tpu.dot_dimension_numbers<[1], [0], [0], [1], [0, 0, 1, 1], [], []>} : vector<8x64xf32>, vector<64x64xf32>, vector<8x64xf32> -> vector<8x64xf32>
    %c7 = arith.constant 7 : index
    %c0_43 = arith.constant 0 : index
    %c0_44 = arith.constant 0 : index
    %59 = vector.load %arg1[%c7, %c0_43, %c0_44] : memref<8x8x64xf32, #tpu.memory_space<vmem>>, vector<1x8x64xf32>
    %60 = vector.shape_cast %59 : vector<1x8x64xf32> to vector<8x64xf32>
    %61 = arith.addf %58, %60 : vector<8x64xf32>
    %62 = math.tanh %61 : vector<8x64xf32>
    %c7_45 = arith.constant 7 : index
    %c0_46 = arith.constant 0 : index
    %c0_47 = arith.constant 0 : index
    %63 = vector.load %arg9[%c7_45, %c0_46, %c0_47] : memref<8x8x64xf32, #tpu.memory_space<vmem>>, vector<1x8x64xf32>
    %64 = vector.shape_cast %63 : vector<1x8x64xf32> to vector<8x64xf32>
    %65 = vector.shape_cast %62 : vector<8x64xf32> to vector<1x8x64xf32>
    tpu.vector_store %arg9[%c7_45, %c0_46, %c0_47], %65 {strides = array<i32>} : memref<8x8x64xf32, #tpu.memory_space<vmem>>, vector<1x8x64xf32>,
    %c0_48 = arith.constant 0 : index
    %c0_49 = arith.constant 0 : index
    %66 = vector.load %arg3[%c0_48, %c0_49] : memref<64x64xf32, #tpu.memory_space<vmem>>, vector<64x64xf32>
    %c0_50 = arith.constant 0 : index
    %c0_51 = arith.constant 0 : index
    %67 = vector.load %arg4[%c0_50, %c0_51] : memref<64x64xf32, #tpu.memory_space<vmem>>, vector<64x64xf32>
    %c0_52 = arith.constant 0 : index
    %c0_53 = arith.constant 0 : index
    %68 = vector.load %arg5[%c0_52, %c0_53] : memref<1x64xf32, #tpu.memory_space<vmem>>, vector<1x64xf32>
    %69 = vector.shape_cast %68 : vector<1x64xf32> to vector<1x64xf32>
    %70 = vector.broadcast %69 : vector<1x64xf32> to vector<8x64xf32>
    %c0_54 = arith.constant 0 : index
    %c0_55 = arith.constant 0 : index
    %c0_56 = arith.constant 0 : index
    %71 = vector.load %arg9[%c0_54, %c0_55, %c0_56] : memref<8x8x64xf32, #tpu.memory_space<vmem>>, vector<1x8x64xf32>
    %72 = vector.shape_cast %71 : vector<1x8x64xf32> to vector<8x64xf32>
    %c7_57 = arith.constant 7 : index
    %c0_58 = arith.constant 0 : index
    %c0_59 = arith.constant 0 : index
    %73 = vector.load %arg9[%c7_57, %c0_58, %c0_59] : memref<8x8x64xf32, #tpu.memory_space<vmem>>, vector<1x8x64xf32>
    %74 = vector.shape_cast %73 : vector<1x8x64xf32> to vector<8x64xf32>
    %75 = arith.select %2, %72, %74 : vector<8x64xi1>, vector<8x64xf32>
    %cst_60 = arith.constant dense<0.000000e+00> : vector<8x64xf32>
    %76 = tpu.matmul %75, %66, %cst_60 {dimension_numbers = #tpu.dot_dimension_numbers<[1], [0], [0], [1], [0, 0, 1, 1], [], []>} : vector<8x64xf32>, vector<64x64xf32>, vector<8x64xf32> -> vector<8x64xf32>
    %77 = arith.addf %76, %70 : vector<8x64xf32>
    %78 = vector.extract_strided_slice %77 {offsets = [0, 0], sizes = [8, 32], strides = [1, 1]} : vector<8x64xf32> to vector<8x32xf32>
    %c0_61 = arith.constant 0 : index
    %c0_62 = arith.constant 0 : index
    %c0_63 = arith.constant 0 : index
    %79 = vector.load %arg10[%c0_61, %c0_62, %c0_63] : memref<8x8x64xf32, #tpu.memory_space<vmem>>, vector<1x8x32xf32>
    %80 = vector.shape_cast %79 : vector<1x8x32xf32> to vector<8x32xf32>
    %81 = vector.shape_cast %78 : vector<8x32xf32> to vector<1x8x32xf32>
    tpu.vector_store %arg10[%c0_61, %c0_62, %c0_63], %81 {strides = array<i32>} : memref<8x8x64xf32, #tpu.memory_space<vmem>>, vector<1x8x32xf32>,
    %82 = vector.extract_strided_slice %77 {offsets = [0, 32], sizes = [8, 32], strides = [1, 1]} : vector<8x64xf32> to vector<8x32xf32>
    %c7_64 = arith.constant 7 : index
    %c0_65 = arith.constant 0 : index
    %c32 = arith.constant 32 : index
    %83 = vector.load %arg10[%c7_64, %c0_65, %c32] : memref<8x8x64xf32, #tpu.memory_space<vmem>>, vector<1x8x32xf32>
    %84 = vector.shape_cast %83 : vector<1x8x32xf32> to vector<8x32xf32>
    %85 = vector.shape_cast %82 : vector<8x32xf32> to vector<1x8x32xf32>
    tpu.vector_store %arg10[%c7_64, %c0_65, %c32], %85 {strides = array<i32>} : memref<8x8x64xf32, #tpu.memory_space<vmem>>, vector<1x8x32xf32>,
    %c1_66 = arith.constant 1 : index
    %c0_67 = arith.constant 0 : index
    %c0_68 = arith.constant 0 : index
    %86 = vector.load %arg9[%c1_66, %c0_67, %c0_68] : memref<8x8x64xf32, #tpu.memory_space<vmem>>, vector<1x8x64xf32>
    %87 = vector.shape_cast %86 : vector<1x8x64xf32> to vector<8x64xf32>
    %c6_69 = arith.constant 6 : index
    %c0_70 = arith.constant 0 : index
    %c0_71 = arith.constant 0 : index
    %88 = vector.load %arg9[%c6_69, %c0_70, %c0_71] : memref<8x8x64xf32, #tpu.memory_space<vmem>>, vector<1x8x64xf32>
    %89 = vector.shape_cast %88 : vector<1x8x64xf32> to vector<8x64xf32>
    %90 = arith.select %2, %87, %89 : vector<8x64xi1>, vector<8x64xf32>
    %cst_72 = arith.constant dense<0.000000e+00> : vector<8x64xf32>
    %91 = tpu.matmul %90, %66, %cst_72 {dimension_numbers = #tpu.dot_dimension_numbers<[1], [0], [0], [1], [0, 0, 1, 1], [], []>} : vector<8x64xf32>, vector<64x64xf32>, vector<8x64xf32> -> vector<8x64xf32>
    %92 = arith.addf %91, %70 : vector<8x64xf32>
    %93 = vector.extract_strided_slice %92 {offsets = [0, 0], sizes = [8, 32], strides = [1, 1]} : vector<8x64xf32> to vector<8x32xf32>
    %c1_73 = arith.constant 1 : index
    %c0_74 = arith.constant 0 : index
    %c0_75 = arith.constant 0 : index
    %94 = vector.load %arg10[%c1_73, %c0_74, %c0_75] : memref<8x8x64xf32, #tpu.memory_space<vmem>>, vector<1x8x32xf32>
    %95 = vector.shape_cast %94 : vector<1x8x32xf32> to vector<8x32xf32>
    %96 = vector.shape_cast %93 : vector<8x32xf32> to vector<1x8x32xf32>
    tpu.vector_store %arg10[%c1_73, %c0_74, %c0_75], %96 {strides = array<i32>} : memref<8x8x64xf32, #tpu.memory_space<vmem>>, vector<1x8x32xf32>,
    %97 = vector.extract_strided_slice %92 {offsets = [0, 32], sizes = [8, 32], strides = [1, 1]} : vector<8x64xf32> to vector<8x32xf32>
    %c6_76 = arith.constant 6 : index
    %c0_77 = arith.constant 0 : index
    %c32_78 = arith.constant 32 : index
    %98 = vector.load %arg10[%c6_76, %c0_77, %c32_78] : memref<8x8x64xf32, #tpu.memory_space<vmem>>, vector<1x8x32xf32>
    %99 = vector.shape_cast %98 : vector<1x8x32xf32> to vector<8x32xf32>
    %100 = vector.shape_cast %97 : vector<8x32xf32> to vector<1x8x32xf32>
    tpu.vector_store %arg10[%c6_76, %c0_77, %c32_78], %100 {strides = array<i32>} : memref<8x8x64xf32, #tpu.memory_space<vmem>>, vector<1x8x32xf32>,
    %c2_79 = arith.constant 2 : index
    %c0_80 = arith.constant 0 : index
    %c0_81 = arith.constant 0 : index
    %101 = vector.load %arg9[%c2_79, %c0_80, %c0_81] : memref<8x8x64xf32, #tpu.memory_space<vmem>>, vector<1x8x64xf32>
    %102 = vector.shape_cast %101 : vector<1x8x64xf32> to vector<8x64xf32>
    %c5_82 = arith.constant 5 : index
    %c0_83 = arith.constant 0 : index
    %c0_84 = arith.constant 0 : index
    %103 = vector.load %arg9[%c5_82, %c0_83, %c0_84] : memref<8x8x64xf32, #tpu.memory_space<vmem>>, vector<1x8x64xf32>
    %104 = vector.shape_cast %103 : vector<1x8x64xf32> to vector<8x64xf32>
    %105 = arith.select %2, %102, %104 : vector<8x64xi1>, vector<8x64xf32>
    %cst_85 = arith.constant dense<0.000000e+00> : vector<8x64xf32>
    %106 = tpu.matmul %105, %66, %cst_85 {dimension_numbers = #tpu.dot_dimension_numbers<[1], [0], [0], [1], [0, 0, 1, 1], [], []>} : vector<8x64xf32>, vector<64x64xf32>, vector<8x64xf32> -> vector<8x64xf32>
    %107 = arith.addf %106, %70 : vector<8x64xf32>
    %108 = vector.extract_strided_slice %107 {offsets = [0, 0], sizes = [8, 32], strides = [1, 1]} : vector<8x64xf32> to vector<8x32xf32>
    %c2_86 = arith.constant 2 : index
    %c0_87 = arith.constant 0 : index
    %c0_88 = arith.constant 0 : index
    %109 = vector.load %arg10[%c2_86, %c0_87, %c0_88] : memref<8x8x64xf32, #tpu.memory_space<vmem>>, vector<1x8x32xf32>
    %110 = vector.shape_cast %109 : vector<1x8x32xf32> to vector<8x32xf32>
    %111 = vector.shape_cast %108 : vector<8x32xf32> to vector<1x8x32xf32>
    tpu.vector_store %arg10[%c2_86, %c0_87, %c0_88], %111 {strides = array<i32>} : memref<8x8x64xf32, #tpu.memory_space<vmem>>, vector<1x8x32xf32>,
    %112 = vector.extract_strided_slice %107 {offsets = [0, 32], sizes = [8, 32], strides = [1, 1]} : vector<8x64xf32> to vector<8x32xf32>
    %c5_89 = arith.constant 5 : index
    %c0_90 = arith.constant 0 : index
    %c32_91 = arith.constant 32 : index
    %113 = vector.load %arg10[%c5_89, %c0_90, %c32_91] : memref<8x8x64xf32, #tpu.memory_space<vmem>>, vector<1x8x32xf32>
    %114 = vector.shape_cast %113 : vector<1x8x32xf32> to vector<8x32xf32>
    %115 = vector.shape_cast %112 : vector<8x32xf32> to vector<1x8x32xf32>
    tpu.vector_store %arg10[%c5_89, %c0_90, %c32_91], %115 {strides = array<i32>} : memref<8x8x64xf32, #tpu.memory_space<vmem>>, vector<1x8x32xf32>,
    %c3_92 = arith.constant 3 : index
    %c0_93 = arith.constant 0 : index
    %c0_94 = arith.constant 0 : index
    %116 = vector.load %arg9[%c3_92, %c0_93, %c0_94] : memref<8x8x64xf32, #tpu.memory_space<vmem>>, vector<1x8x64xf32>
    %117 = vector.shape_cast %116 : vector<1x8x64xf32> to vector<8x64xf32>
    %c4_95 = arith.constant 4 : index
    %c0_96 = arith.constant 0 : index
    %c0_97 = arith.constant 0 : index
    %118 = vector.load %arg9[%c4_95, %c0_96, %c0_97] : memref<8x8x64xf32, #tpu.memory_space<vmem>>, vector<1x8x64xf32>
    %119 = vector.shape_cast %118 : vector<1x8x64xf32> to vector<8x64xf32>
    %120 = arith.select %2, %117, %119 : vector<8x64xi1>, vector<8x64xf32>
    %cst_98 = arith.constant dense<0.000000e+00> : vector<8x64xf32>
    %121 = tpu.matmul %120, %66, %cst_98 {dimension_numbers = #tpu.dot_dimension_numbers<[1], [0], [0], [1], [0, 0, 1, 1], [], []>} : vector<8x64xf32>, vector<64x64xf32>, vector<8x64xf32> -> vector<8x64xf32>
    %122 = arith.addf %121, %70 : vector<8x64xf32>
    %123 = vector.extract_strided_slice %122 {offsets = [0, 0], sizes = [8, 32], strides = [1, 1]} : vector<8x64xf32> to vector<8x32xf32>
    %c3_99 = arith.constant 3 : index
    %c0_100 = arith.constant 0 : index
    %c0_101 = arith.constant 0 : index
    %124 = vector.load %arg10[%c3_99, %c0_100, %c0_101] : memref<8x8x64xf32, #tpu.memory_space<vmem>>, vector<1x8x32xf32>
    %125 = vector.shape_cast %124 : vector<1x8x32xf32> to vector<8x32xf32>
    %126 = vector.shape_cast %123 : vector<8x32xf32> to vector<1x8x32xf32>
    tpu.vector_store %arg10[%c3_99, %c0_100, %c0_101], %126 {strides = array<i32>} : memref<8x8x64xf32, #tpu.memory_space<vmem>>, vector<1x8x32xf32>,
    %127 = vector.extract_strided_slice %122 {offsets = [0, 32], sizes = [8, 32], strides = [1, 1]} : vector<8x64xf32> to vector<8x32xf32>
    %c4_102 = arith.constant 4 : index
    %c0_103 = arith.constant 0 : index
    %c32_104 = arith.constant 32 : index
    %128 = vector.load %arg10[%c4_102, %c0_103, %c32_104] : memref<8x8x64xf32, #tpu.memory_space<vmem>>, vector<1x8x32xf32>
    %129 = vector.shape_cast %128 : vector<1x8x32xf32> to vector<8x32xf32>
    %130 = vector.shape_cast %127 : vector<8x32xf32> to vector<1x8x32xf32>
    tpu.vector_store %arg10[%c4_102, %c0_103, %c32_104], %130 {strides = array<i32>} : memref<8x8x64xf32, #tpu.memory_space<vmem>>, vector<1x8x32xf32>,
    %c4_105 = arith.constant 4 : index
    %c0_106 = arith.constant 0 : index
    %c0_107 = arith.constant 0 : index
    %131 = vector.load %arg9[%c4_105, %c0_106, %c0_107] : memref<8x8x64xf32, #tpu.memory_space<vmem>>, vector<1x8x64xf32>
    %132 = vector.shape_cast %131 : vector<1x8x64xf32> to vector<8x64xf32>
    %c3_108 = arith.constant 3 : index
    %c0_109 = arith.constant 0 : index
    %c0_110 = arith.constant 0 : index
    %133 = vector.load %arg9[%c3_108, %c0_109, %c0_110] : memref<8x8x64xf32, #tpu.memory_space<vmem>>, vector<1x8x64xf32>
    %134 = vector.shape_cast %133 : vector<1x8x64xf32> to vector<8x64xf32>
    %135 = arith.select %2, %132, %134 : vector<8x64xi1>, vector<8x64xf32>
    %cst_111 = arith.constant dense<0.000000e+00> : vector<8x64xf32>
    %136 = tpu.matmul %135, %66, %cst_111 {dimension_numbers = #tpu.dot_dimension_numbers<[1], [0], [0], [1], [0, 0, 1, 1], [], []>} : vector<8x64xf32>, vector<64x64xf32>, vector<8x64xf32> -> vector<8x64xf32>
    %137 = arith.addf %136, %70 : vector<8x64xf32>
    %138 = vector.extract_strided_slice %137 {offsets = [0, 0], sizes = [8, 32], strides = [1, 1]} : vector<8x64xf32> to vector<8x32xf32>
    %c4_112 = arith.constant 4 : index
    %c0_113 = arith.constant 0 : index
    %c0_114 = arith.constant 0 : index
    %139 = vector.load %arg10[%c4_112, %c0_113, %c0_114] : memref<8x8x64xf32, #tpu.memory_space<vmem>>, vector<1x8x32xf32>
    %140 = vector.shape_cast %139 : vector<1x8x32xf32> to vector<8x32xf32>
    %141 = vector.shape_cast %138 : vector<8x32xf32> to vector<1x8x32xf32>
    tpu.vector_store %arg10[%c4_112, %c0_113, %c0_114], %141 {strides = array<i32>} : memref<8x8x64xf32, #tpu.memory_space<vmem>>, vector<1x8x32xf32>,
    %142 = vector.extract_strided_slice %137 {offsets = [0, 32], sizes = [8, 32], strides = [1, 1]} : vector<8x64xf32> to vector<8x32xf32>
    %c3_115 = arith.constant 3 : index
    %c0_116 = arith.constant 0 : index
    %c32_117 = arith.constant 32 : index
    %143 = vector.load %arg10[%c3_115, %c0_116, %c32_117] : memref<8x8x64xf32, #tpu.memory_space<vmem>>, vector<1x8x32xf32>
    %144 = vector.shape_cast %143 : vector<1x8x32xf32> to vector<8x32xf32>
    %145 = vector.shape_cast %142 : vector<8x32xf32> to vector<1x8x32xf32>
    tpu.vector_store %arg10[%c3_115, %c0_116, %c32_117], %145 {strides = array<i32>} : memref<8x8x64xf32, #tpu.memory_space<vmem>>, vector<1x8x32xf32>,
    %c5_118 = arith.constant 5 : index
    %c0_119 = arith.constant 0 : index
    %c0_120 = arith.constant 0 : index
    %146 = vector.load %arg9[%c5_118, %c0_119, %c0_120] : memref<8x8x64xf32, #tpu.memory_space<vmem>>, vector<1x8x64xf32>
    %147 = vector.shape_cast %146 : vector<1x8x64xf32> to vector<8x64xf32>
    %c2_121 = arith.constant 2 : index
    %c0_122 = arith.constant 0 : index
    %c0_123 = arith.constant 0 : index
    %148 = vector.load %arg9[%c2_121, %c0_122, %c0_123] : memref<8x8x64xf32, #tpu.memory_space<vmem>>, vector<1x8x64xf32>
    %149 = vector.shape_cast %148 : vector<1x8x64xf32> to vector<8x64xf32>
    %150 = arith.select %2, %147, %149 : vector<8x64xi1>, vector<8x64xf32>
    %cst_124 = arith.constant dense<0.000000e+00> : vector<8x64xf32>
    %151 = tpu.matmul %150, %66, %cst_124 {dimension_numbers = #tpu.dot_dimension_numbers<[1], [0], [0], [1], [0, 0, 1, 1], [], []>} : vector<8x64xf32>, vector<64x64xf32>, vector<8x64xf32> -> vector<8x64xf32>
    %152 = arith.addf %151, %70 : vector<8x64xf32>
    %153 = vector.extract_strided_slice %152 {offsets = [0, 0], sizes = [8, 32], strides = [1, 1]} : vector<8x64xf32> to vector<8x32xf32>
    %c5_125 = arith.constant 5 : index
    %c0_126 = arith.constant 0 : index
    %c0_127 = arith.constant 0 : index
    %154 = vector.load %arg10[%c5_125, %c0_126, %c0_127] : memref<8x8x64xf32, #tpu.memory_space<vmem>>, vector<1x8x32xf32>
    %155 = vector.shape_cast %154 : vector<1x8x32xf32> to vector<8x32xf32>
    %156 = vector.shape_cast %153 : vector<8x32xf32> to vector<1x8x32xf32>
    tpu.vector_store %arg10[%c5_125, %c0_126, %c0_127], %156 {strides = array<i32>} : memref<8x8x64xf32, #tpu.memory_space<vmem>>, vector<1x8x32xf32>,
    %157 = vector.extract_strided_slice %152 {offsets = [0, 32], sizes = [8, 32], strides = [1, 1]} : vector<8x64xf32> to vector<8x32xf32>
    %c2_128 = arith.constant 2 : index
    %c0_129 = arith.constant 0 : index
    %c32_130 = arith.constant 32 : index
    %158 = vector.load %arg10[%c2_128, %c0_129, %c32_130] : memref<8x8x64xf32, #tpu.memory_space<vmem>>, vector<1x8x32xf32>
    %159 = vector.shape_cast %158 : vector<1x8x32xf32> to vector<8x32xf32>
    %160 = vector.shape_cast %157 : vector<8x32xf32> to vector<1x8x32xf32>
    tpu.vector_store %arg10[%c2_128, %c0_129, %c32_130], %160 {strides = array<i32>} : memref<8x8x64xf32, #tpu.memory_space<vmem>>, vector<1x8x32xf32>,
    %c6_131 = arith.constant 6 : index
    %c0_132 = arith.constant 0 : index
    %c0_133 = arith.constant 0 : index
    %161 = vector.load %arg9[%c6_131, %c0_132, %c0_133] : memref<8x8x64xf32, #tpu.memory_space<vmem>>, vector<1x8x64xf32>
    %162 = vector.shape_cast %161 : vector<1x8x64xf32> to vector<8x64xf32>
    %c1_134 = arith.constant 1 : index
    %c0_135 = arith.constant 0 : index
    %c0_136 = arith.constant 0 : index
    %163 = vector.load %arg9[%c1_134, %c0_135, %c0_136] : memref<8x8x64xf32, #tpu.memory_space<vmem>>, vector<1x8x64xf32>
    %164 = vector.shape_cast %163 : vector<1x8x64xf32> to vector<8x64xf32>
    %165 = arith.select %2, %162, %164 : vector<8x64xi1>, vector<8x64xf32>
    %cst_137 = arith.constant dense<0.000000e+00> : vector<8x64xf32>
    %166 = tpu.matmul %165, %66, %cst_137 {dimension_numbers = #tpu.dot_dimension_numbers<[1], [0], [0], [1], [0, 0, 1, 1], [], []>} : vector<8x64xf32>, vector<64x64xf32>, vector<8x64xf32> -> vector<8x64xf32>
    %167 = arith.addf %166, %70 : vector<8x64xf32>
    %168 = vector.extract_strided_slice %167 {offsets = [0, 0], sizes = [8, 32], strides = [1, 1]} : vector<8x64xf32> to vector<8x32xf32>
    %c6_138 = arith.constant 6 : index
    %c0_139 = arith.constant 0 : index
    %c0_140 = arith.constant 0 : index
    %169 = vector.load %arg10[%c6_138, %c0_139, %c0_140] : memref<8x8x64xf32, #tpu.memory_space<vmem>>, vector<1x8x32xf32>
    %170 = vector.shape_cast %169 : vector<1x8x32xf32> to vector<8x32xf32>
    %171 = vector.shape_cast %168 : vector<8x32xf32> to vector<1x8x32xf32>
    tpu.vector_store %arg10[%c6_138, %c0_139, %c0_140], %171 {strides = array<i32>} : memref<8x8x64xf32, #tpu.memory_space<vmem>>, vector<1x8x32xf32>,
    %172 = vector.extract_strided_slice %167 {offsets = [0, 32], sizes = [8, 32], strides = [1, 1]} : vector<8x64xf32> to vector<8x32xf32>
    %c1_141 = arith.constant 1 : index
    %c0_142 = arith.constant 0 : index
    %c32_143 = arith.constant 32 : index
    %173 = vector.load %arg10[%c1_141, %c0_142, %c32_143] : memref<8x8x64xf32, #tpu.memory_space<vmem>>, vector<1x8x32xf32>
    %174 = vector.shape_cast %173 : vector<1x8x32xf32> to vector<8x32xf32>
    %175 = vector.shape_cast %172 : vector<8x32xf32> to vector<1x8x32xf32>
    tpu.vector_store %arg10[%c1_141, %c0_142, %c32_143], %175 {strides = array<i32>} : memref<8x8x64xf32, #tpu.memory_space<vmem>>, vector<1x8x32xf32>,
    %c7_144 = arith.constant 7 : index
    %c0_145 = arith.constant 0 : index
    %c0_146 = arith.constant 0 : index
    %176 = vector.load %arg9[%c7_144, %c0_145, %c0_146] : memref<8x8x64xf32, #tpu.memory_space<vmem>>, vector<1x8x64xf32>
    %177 = vector.shape_cast %176 : vector<1x8x64xf32> to vector<8x64xf32>
    %c0_147 = arith.constant 0 : index
    %c0_148 = arith.constant 0 : index
    %c0_149 = arith.constant 0 : index
    %178 = vector.load %arg9[%c0_147, %c0_148, %c0_149] : memref<8x8x64xf32, #tpu.memory_space<vmem>>, vector<1x8x64xf32>
    %179 = vector.shape_cast %178 : vector<1x8x64xf32> to vector<8x64xf32>
    %180 = arith.select %2, %177, %179 : vector<8x64xi1>, vector<8x64xf32>
    %cst_150 = arith.constant dense<0.000000e+00> : vector<8x64xf32>
    %181 = tpu.matmul %180, %66, %cst_150 {dimension_numbers = #tpu.dot_dimension_numbers<[1], [0], [0], [1], [0, 0, 1, 1], [], []>} : vector<8x64xf32>, vector<64x64xf32>, vector<8x64xf32> -> vector<8x64xf32>
    %182 = arith.addf %181, %70 : vector<8x64xf32>
    %183 = vector.extract_strided_slice %182 {offsets = [0, 0], sizes = [8, 32], strides = [1, 1]} : vector<8x64xf32> to vector<8x32xf32>
    %c7_151 = arith.constant 7 : index
    %c0_152 = arith.constant 0 : index
    %c0_153 = arith.constant 0 : index
    %184 = vector.load %arg10[%c7_151, %c0_152, %c0_153] : memref<8x8x64xf32, #tpu.memory_space<vmem>>, vector<1x8x32xf32>
    %185 = vector.shape_cast %184 : vector<1x8x32xf32> to vector<8x32xf32>
    %186 = vector.shape_cast %183 : vector<8x32xf32> to vector<1x8x32xf32>
    tpu.vector_store %arg10[%c7_151, %c0_152, %c0_153], %186 {strides = array<i32>} : memref<8x8x64xf32, #tpu.memory_space<vmem>>, vector<1x8x32xf32>,
    %187 = vector.extract_strided_slice %182 {offsets = [0, 32], sizes = [8, 32], strides = [1, 1]} : vector<8x64xf32> to vector<8x32xf32>
    %c0_154 = arith.constant 0 : index
    %c0_155 = arith.constant 0 : index
    %c32_156 = arith.constant 32 : index
    %188 = vector.load %arg10[%c0_154, %c0_155, %c32_156] : memref<8x8x64xf32, #tpu.memory_space<vmem>>, vector<1x8x32xf32>
    %189 = vector.shape_cast %188 : vector<1x8x32xf32> to vector<8x32xf32>
    %190 = vector.shape_cast %187 : vector<8x32xf32> to vector<1x8x32xf32>
    tpu.vector_store %arg10[%c0_154, %c0_155, %c32_156], %190 {strides = array<i32>} : memref<8x8x64xf32, #tpu.memory_space<vmem>>, vector<1x8x32xf32>,
    %c0_157 = arith.constant 0 : index
    %c0_158 = arith.constant 0 : index
    %c0_159 = arith.constant 0 : index
    %191 = vector.load %arg10[%c0_157, %c0_158, %c0_159] : memref<8x8x64xf32, #tpu.memory_space<vmem>>, vector<1x8x64xf32>
    %192 = vector.shape_cast %191 : vector<1x8x64xf32> to vector<8x64xf32>
    %193 = math.tanh %192 : vector<8x64xf32>
    %cst_160 = arith.constant dense<0.000000e+00> : vector<8x64xf32>
    %194 = tpu.matmul %193, %67, %cst_160 {dimension_numbers = #tpu.dot_dimension_numbers<[1], [0], [0], [1], [0, 0, 1, 1], [], []>} : vector<8x64xf32>, vector<64x64xf32>, vector<8x64xf32> -> vector<8x64xf32>
    %c1_161 = arith.constant 1 : index
    %c0_162 = arith.constant 0 : index
    %c0_163 = arith.constant 0 : index
    %195 = vector.load %arg10[%c1_161, %c0_162, %c0_163] : memref<8x8x64xf32, #tpu.memory_space<vmem>>, vector<1x8x64xf32>
    %196 = vector.shape_cast %195 : vector<1x8x64xf32> to vector<8x64xf32>
    %197 = arith.addf %194, %196 : vector<8x64xf32>
    %198 = math.tanh %197 : vector<8x64xf32>
    %cst_164 = arith.constant dense<0.000000e+00> : vector<8x64xf32>
    %199 = tpu.matmul %198, %67, %cst_164 {dimension_numbers = #tpu.dot_dimension_numbers<[1], [0], [0], [1], [0, 0, 1, 1], [], []>} : vector<8x64xf32>, vector<64x64xf32>, vector<8x64xf32> -> vector<8x64xf32>
    %c2_165 = arith.constant 2 : index
    %c0_166 = arith.constant 0 : index
    %c0_167 = arith.constant 0 : index
    %200 = vector.load %arg10[%c2_165, %c0_166, %c0_167] : memref<8x8x64xf32, #tpu.memory_space<vmem>>, vector<1x8x64xf32>
    %201 = vector.shape_cast %200 : vector<1x8x64xf32> to vector<8x64xf32>
    %202 = arith.addf %199, %201 : vector<8x64xf32>
    %203 = math.tanh %202 : vector<8x64xf32>
    %cst_168 = arith.constant dense<0.000000e+00> : vector<8x64xf32>
    %204 = tpu.matmul %203, %67, %cst_168 {dimension_numbers = #tpu.dot_dimension_numbers<[1], [0], [0], [1], [0, 0, 1, 1], [], []>} : vector<8x64xf32>, vector<64x64xf32>, vector<8x64xf32> -> vector<8x64xf32>
    %c3_169 = arith.constant 3 : index
    %c0_170 = arith.constant 0 : index
    %c0_171 = arith.constant 0 : index
    %205 = vector.load %arg10[%c3_169, %c0_170, %c0_171] : memref<8x8x64xf32, #tpu.memory_space<vmem>>, vector<1x8x64xf32>
    %206 = vector.shape_cast %205 : vector<1x8x64xf32> to vector<8x64xf32>
    %207 = arith.addf %204, %206 : vector<8x64xf32>
    %208 = math.tanh %207 : vector<8x64xf32>
    %cst_172 = arith.constant dense<0.000000e+00> : vector<8x64xf32>
    %209 = tpu.matmul %208, %67, %cst_172 {dimension_numbers = #tpu.dot_dimension_numbers<[1], [0], [0], [1], [0, 0, 1, 1], [], []>} : vector<8x64xf32>, vector<64x64xf32>, vector<8x64xf32> -> vector<8x64xf32>
    %c4_173 = arith.constant 4 : index
    %c0_174 = arith.constant 0 : index
    %c0_175 = arith.constant 0 : index
    %210 = vector.load %arg10[%c4_173, %c0_174, %c0_175] : memref<8x8x64xf32, #tpu.memory_space<vmem>>, vector<1x8x64xf32>
    %211 = vector.shape_cast %210 : vector<1x8x64xf32> to vector<8x64xf32>
    %212 = arith.addf %209, %211 : vector<8x64xf32>
    %213 = math.tanh %212 : vector<8x64xf32>
    %cst_176 = arith.constant dense<0.000000e+00> : vector<8x64xf32>
    %214 = tpu.matmul %213, %67, %cst_176 {dimension_numbers = #tpu.dot_dimension_numbers<[1], [0], [0], [1], [0, 0, 1, 1], [], []>} : vector<8x64xf32>, vector<64x64xf32>, vector<8x64xf32> -> vector<8x64xf32>
    %c5_177 = arith.constant 5 : index
    %c0_178 = arith.constant 0 : index
    %c0_179 = arith.constant 0 : index
    %215 = vector.load %arg10[%c5_177, %c0_178, %c0_179] : memref<8x8x64xf32, #tpu.memory_space<vmem>>, vector<1x8x64xf32>
    %216 = vector.shape_cast %215 : vector<1x8x64xf32> to vector<8x64xf32>
    %217 = arith.addf %214, %216 : vector<8x64xf32>
    %218 = math.tanh %217 : vector<8x64xf32>
    %cst_180 = arith.constant dense<0.000000e+00> : vector<8x64xf32>
    %219 = tpu.matmul %218, %67, %cst_180 {dimension_numbers = #tpu.dot_dimension_numbers<[1], [0], [0], [1], [0, 0, 1, 1], [], []>} : vector<8x64xf32>, vector<64x64xf32>, vector<8x64xf32> -> vector<8x64xf32>
    %c6_181 = arith.constant 6 : index
    %c0_182 = arith.constant 0 : index
    %c0_183 = arith.constant 0 : index
    %220 = vector.load %arg10[%c6_181, %c0_182, %c0_183] : memref<8x8x64xf32, #tpu.memory_space<vmem>>, vector<1x8x64xf32>
    %221 = vector.shape_cast %220 : vector<1x8x64xf32> to vector<8x64xf32>
    %222 = arith.addf %219, %221 : vector<8x64xf32>
    %223 = math.tanh %222 : vector<8x64xf32>
    %cst_184 = arith.constant dense<0.000000e+00> : vector<8x64xf32>
    %224 = tpu.matmul %223, %67, %cst_184 {dimension_numbers = #tpu.dot_dimension_numbers<[1], [0], [0], [1], [0, 0, 1, 1], [], []>} : vector<8x64xf32>, vector<64x64xf32>, vector<8x64xf32> -> vector<8x64xf32>
    %c7_185 = arith.constant 7 : index
    %c0_186 = arith.constant 0 : index
    %c0_187 = arith.constant 0 : index
    %225 = vector.load %arg10[%c7_185, %c0_186, %c0_187] : memref<8x8x64xf32, #tpu.memory_space<vmem>>, vector<1x8x64xf32>
    %226 = vector.shape_cast %225 : vector<1x8x64xf32> to vector<8x64xf32>
    %227 = arith.addf %224, %226 : vector<8x64xf32>
    %228 = math.tanh %227 : vector<8x64xf32>
    %c0_188 = arith.constant 0 : index
    %c0_189 = arith.constant 0 : index
    %229 = vector.load %arg6[%c0_188, %c0_189] : memref<64x4xf32, #tpu.memory_space<vmem>>, vector<64x4xf32>
    %cst_190 = arith.constant dense<0.000000e+00> : vector<8x4xf32>
    %230 = tpu.matmul %228, %229, %cst_190 {dimension_numbers = #tpu.dot_dimension_numbers<[1], [0], [0], [1], [0, 0, 1, 1], [], []>} : vector<8x64xf32>, vector<64x4xf32>, vector<8x4xf32> -> vector<8x4xf32>
    %c0_191 = arith.constant 0 : index
    %c0_192 = arith.constant 0 : index
    %231 = vector.load %arg7[%c0_191, %c0_192] : memref<1x4xf32, #tpu.memory_space<vmem>>, vector<1x4xf32>
    %232 = vector.broadcast %231 : vector<1x4xf32> to vector<8x4xf32>
    %233 = arith.addf %230, %232 : vector<8x4xf32>
    %cst_193 = arith.constant dense<0xFF800000> : vector<8xf32>
    %234 = vector.multi_reduction <maximumf>, %233, %cst_193 [1] : vector<8x4xf32> to vector<8xf32>
    %235 = vector.shape_cast %234 : vector<8xf32> to vector<8x1xf32>
    %236 = vector.broadcast %235 : vector<8x1xf32> to vector<8x4xf32>
    %237 = arith.subf %233, %236 : vector<8x4xf32>
    %238 = math.exp %237 : vector<8x4xf32>
    %cst_194 = arith.constant dense<0.000000e+00> : vector<8xf32>
    %239 = vector.multi_reduction <add>, %238, %cst_194 [1] : vector<8x4xf32> to vector<8xf32>
    %240 = vector.shape_cast %239 : vector<8xf32> to vector<8x1xf32>
    %241 = tpu.reciprocal %240 {approx = true} : vector<8x1xf32> -> vector<8x1xf32>
    %242 = vector.broadcast %241 : vector<8x1xf32> to vector<8x4xf32>
    %243 = arith.mulf %238, %242 : vector<8x4xf32>
    %c0_195 = arith.constant 0 : index
    %c0_196 = arith.constant 0 : index
    %244 = vector.load %arg8[%c0_195, %c0_196] : memref<8x4xf32, #tpu.memory_space<vmem>>, vector<8x4xf32>
    tpu.vector_store %arg8[%c0_195, %c0_196], %243 {strides = array<i32>} : memref<8x4xf32, #tpu.memory_space<vmem>>, vector<8x4xf32>,
    return
  }
  func.func @transform_0(%arg0: i32) -> (i32, i32, i32) {
    %c0_i32 = arith.constant 0 : i32
    %c0_i32_0 = arith.constant 0 : i32
    %c0_i32_1 = arith.constant 0 : i32
    return %c0_i32, %arg0, %c0_i32_0 : i32, i32, i32
  }
  func.func @transform_1(%arg0: i32) -> (i32, i32) {
    %c0_i32 = arith.constant 0 : i32
    %c0_i32_0 = arith.constant 0 : i32
    %c0_i32_1 = arith.constant 0 : i32
    return %c0_i32, %c0_i32_0 : i32, i32
  }
  func.func @transform_2(%arg0: i32) -> (i32, i32) {
    %c0_i32 = arith.constant 0 : i32
    %c0_i32_0 = arith.constant 0 : i32
    %c0_i32_1 = arith.constant 0 : i32
    return %c0_i32, %c0_i32_0 : i32, i32
  }
  func.func @transform_3(%arg0: i32) -> (i32, i32) {
    %c0_i32 = arith.constant 0 : i32
    %c0_i32_0 = arith.constant 0 : i32
    %c0_i32_1 = arith.constant 0 : i32
    return %c0_i32, %c0_i32_0 : i32, i32
  }
  func.func @transform_4(%arg0: i32) -> (i32, i32) {
    %c0_i32 = arith.constant 0 : i32
    %c0_i32_0 = arith.constant 0 : i32
    %c0_i32_1 = arith.constant 0 : i32
    return %c0_i32, %c0_i32_0 : i32, i32
  }
  func.func @transform_5(%arg0: i32) -> (i32, i32) {
    %c0_i32 = arith.constant 0 : i32
    %c0_i32_0 = arith.constant 0 : i32
    %c0_i32_1 = arith.constant 0 : i32
    return %c0_i32, %c0_i32_0 : i32, i32
  }
  func.func @transform_6(%arg0: i32) -> (i32, i32) {
    %c0_i32 = arith.constant 0 : i32
    %c0_i32_0 = arith.constant 0 : i32
    %c0_i32_1 = arith.constant 0 : i32
    return %c0_i32, %c0_i32_0 : i32, i32
  }
  func.func @transform_7(%arg0: i32) -> (i32, i32) {
    %c0_i32 = arith.constant 0 : i32
    %c0_i32_0 = arith.constant 0 : i32
    return %arg0, %c0_i32 : i32, i32
  }
}

</mosaic_0001>

<bundles_post_ra>
// kernel: rnn_forward.1
= control target key start
LH: loop header
LB: loop body
LE: loop exit
PB: predicated region body
PF: predicated region fallthrough
CT: control target
= control target key end

     0   :  { %s3059_s24 = smov 0   ;;  %s3061_s25 = smov 0   ;;  %s3786_s0 = inlined_call_operand.vmem [shape: f32[8,16,64], index: 0, kind: input, shape index: {}]   ;;  %s3787_s1 = inlined_call_operand.vmem [shape: f32[64,64], index: 1, kind: input, shape index: {}]   ;;  %s3788_s2 = inlined_call_operand.vmem [shape: f32[64,64], index: 2, kind: input, shape index: {}]   ;;  %s3789_s3 = inlined_call_operand.vmem [shape: f32[64,64], index: 3, kind: input, shape index: {}]   ;;  %s3790_s4 = inlined_call_operand.vmem [shape: f32[1,64], index: 4, kind: input, shape index: {}]   ;;  %s3791_s5 = inlined_call_operand.vmem [shape: f32[64,4], index: 5, kind: input, shape index: {}]   ;;  %s3792_s6 = inlined_call_operand.vmem [shape: f32[1,4], index: 6, kind: input, shape index: {}]   ;;  %s3793_s7 = inlined_call_operand.vmem [shape: f32[16,4], index: 7, kind: output, shape index: {}]  }
   0x1   :  { %s3063_s26 = smov 0  }
   0x2 LB: > { %s2244_s27 = sadd.s32 4294967295, %s3015_s26   ;;  %s3076_s28 = sadd.s32 1, %s3015_s26   ;;  %s3015_s26 = sphi %s3063_s26, %s3796_s26   ;;  %s3011_s25 = sphi %s3061_s25, %s3795_s25   ;;  %s3007_s24 = sphi %s3059_s24, %s3794_s24  }
   0x3   : > { %s21_s29 = ssub.s32 %s3015_s26, %s3076_s28  ;;  %s24_s30 = sadd.s32 1, %s3011_s25 }
   0x4   : > { %p22_p0 = scmp.eq.s32.totalorder %s21_s29, 0  ;;  %p31_p1 = scmp.ne.s32.totalorder %s3011_s25, %s3007_s24 }
   0x5   : > { %p32_p2 = scmp.eq.s32.totalorder %s3015_s26, 0  ;;  %p2247_p4 = scmp.ge.s32.totalorder %s3015_s26, 2 }
   0x6   : > { %s3085_s8 = scalar_select %p22_p0, %s3011_s25, %s24_s30  }
   0x7   : > { %p33_p3 = por %p32_p2, %p31_p1  ;;  %227 = sbr.rel (%p2247_p4) target bundleno = 20 (0x14), region = 40 }
   0xc   : > { %230 = sbr.rel (!%p33_p3) target bundleno = 20 (0x14), region = 44  ;;  %s232_s9 = sand.u32 (%p33_p3), 1, %s3011_s25  }
   0xd   : > { %s2249_s10 = sshll.u32 (%p33_p3), %s3015_s26, 3  ;;  %s2248_s11 = sshll.u32 (%p33_p3), %s232_s9, 6 }
   0xe   : > { %s236_s14 = scalar_lea.vmem (%p33_p3), %s3786_s0, %s2249_s10  ;;  %s234_s15 = scalar_lea.vmem (%p33_p3), [#allocation4], %s2248_s11 }
   0xf   : > { %v279_v0 = vld [vmem:[%s236_s14] sm:$0xff] (%p33_p3)  ;;  %v281_v1 = vld [vmem:[%s236_s14 + $0x10] sm:$0xff] (%p33_p3) }
  0x10   : > { %v283_v2 = vld [vmem:[%s236_s14 + $0x20] sm:$0xff] (%p33_p3)  ;;  %280 = vst [vmem:[%s234_s15] sm:$0xff] (%p33_p3), %v279_v0  ;;  %282 = vst [vmem:[%s234_s15 + $0x8] sm:$0xff] (%p33_p3), %v281_v1  ;;  %v285_v3 = vld [vmem:[%s236_s14 + $0x30] sm:$0xff] (%p33_p3) }
  0x11   : > { %284 = vst [vmem:[%s234_s15 + $0x10] sm:$0xff] %v283_v2  ;;  %v287_v4 = vld [vmem:[%s236_s14 + $0x40] sm:$0xff]  ;;  %v289_v5 = vld [vmem:[%s236_s14 + $0x50] sm:$0xff]  ;;  %286 = vst [vmem:[%s234_s15 + $0x18] sm:$0xff] %v285_v3 }
  0x12   : > { %288 = vst [vmem:[%s234_s15 + $0x20] sm:$0xff] %v287_v4  ;;  %290 = vst [vmem:[%s234_s15 + $0x28] sm:$0xff] %v289_v5  ;;  %v291_v6 = vld [vmem:[%s236_s14 + $0x60] sm:$0xff]  ;;  %v293_v7 = vld [vmem:[%s236_s14 + $0x70] sm:$0xff] }
  0x13   : > { %292 = vst [vmem:[%s234_s15 + $0x30] sm:$0xff] %v291_v6  ;;  %294 = vst [vmem:[%s234_s15 + $0x38] sm:$0xff] %v293_v7 }
  0x14 PF: > { %p2250_p5 = scmp.ge.s32.totalorder %s3015_s26, 1  ;;  %p299_p6 = scmp.lt.s32.totalorder %s3015_s26, 3 }
  0x16   : > { %p300_p7 = pnand %p2250_p5, %p299_p6 }
  0x17   : > { %s306_s18 = sand.u32 (!%p300_p7), 1, %s3007_s24   ;;  %p336_p8 = scmp.lt.s32.totalorder (!%p300_p7), %s2244_s27, 1 }
  0x18   : > { %303 = sbr.rel (%p300_p7) target bundleno = 3708 (0xe7c), region = 82  ;;  %s2251_s21 = sshll.u32 (!%p300_p7), %s306_s18, 6 }
  0x19   : > { %s3117_s24 = scalar_lea.vmem (!%p300_p7), [#allocation4], %s2251_s21 }
  0x1d   : > { %v3098_v8 = vld [vmem:[%s3787_s1 + $0x38] sm:$0xff]  ;;  %v3017_v9 = vmov 0.0   ;;  %v3105_v10 = vld [vmem:[%s3787_s1 + $0x30] sm:$0xff]  ;;  %vm3018_vm0 = vmmov 0   ;;  %v3115_v11 = vld [vmem:[%s3787_s1 + $0x28] sm:$0xff]  ;;  %vm353_vm1 = vcmask 523264   ;;  %v340_v38 = vlaneseq }
  0x1e   : > { %2494 = vmatprep.subr.mxu0 %v3017_v9  ;;  %2510 = vmatprep.mubr.msk.f32.mxu0 %vm3018_vm0, %v3017_v9  ;;  %v351_v12 = vld [vmem:[%s3117_s24] sm:$0xff]  ;;  %v3136_v14 = vld [vmem:[%s3787_s1 + $0x18] sm:$0xff]  ;;  %v3145_v15 = vld [vmem:[%s3787_s1 + $0x10] sm:$0xff]  ;;  %vm1000_vm3 = vcmask 261120   ;;  %vm1003_vm4 = vcmask 523520   ;;  %vm2172_vm5 = vcmask 31744  }
  0x1f   : > { %2495 = vmatpush3.msra.mxu0 %v3098_v8  ;;  %2513 = vmatprep.subr.mxu1 %v3017_v9  ;;  %2957 = vtanh.f32 %v351_v12  ;;  %v3127_v13 = vld [vmem:[%s3787_s1 + $0x20] sm:$0xff]  ;;  %v3154_v16 = vld [vmem:[%s3787_s1 + $0x8] sm:$0xff]  ;;  %v2255_v24 = vld [vmem:[%s3117_s24 + $0x10] sm:$0xff]  ;;  %v3266_v40 = vand.u32 127, %v340_v38  ;;  %s3798_s27 = smov (!%p336_p8, %s2244_s27), 1 }
  0x20   : > { %2496 = vmatprep.subr.mxu0 %v3017_v9  ;;  %2514 = vmatpush3.msra.mxu1 %v3098_v8  ;;  %v3163_v17 = vld [vmem:[%s3787_s1] sm:$0xff]  ;;  %v2253_v19 = vld [vmem:[%s3117_s24 + $0x8] sm:$0xff]  ;;  %v2257_v29 = vld [vmem:[%s3117_s24 + $0x18] sm:$0xff]  ;;  %s2252_s16 = sshll.u32 %s3798_s27, 3 }
  0x21   : > { %2497 = vmatpush3.msra.mxu0 %v3105_v10  ;;  %2515 = vmatprep.subr.mxu1 %v3017_v9  ;;  %v2259_v34 = vld [vmem:[%s3117_s24 + $0x20] sm:$0xff]  ;;  %vm342_vm2 = vcmp.lt.s32.totalorder %v3266_v40, 32  ;;  %v2261_v44 = vld [vmem:[%s3117_s24 + $0x28] sm:$0xff]  ;;  %v3312_v52 = vld [vmem:[%s3788_s2 + $0x38] sm:$0xff]  ;;  %s339_s18 = scalar_lea.vmem %s3793_s7, %s2252_s16 }
  0x22   : > { %2498 = vmatprep.subr.mxu0 %v3017_v9  ;;  %2516 = vmatpush3.msra.mxu1 %v3105_v10  ;;  %v3319_v53 = vld [vmem:[%s3788_s2 + $0x30] sm:$0xff]  ;;  %v3325_v54 = vld [vmem:[%s3788_s2 + $0x28] sm:$0xff]  ;;  %v3332_v55 = vld [vmem:[%s3788_s2 + $0x20] sm:$0xff] }
  0x23   : > { %2499 = vmatpush3.msra.mxu0 %v3115_v11  ;;  %2517 = vmatprep.subr.mxu1 %v3017_v9  ;;  %v3339_v56 = vld [vmem:[%s3788_s2 + $0x18] sm:$0xff]  ;;  %v3346_v57 = vld [vmem:[%s3788_s2 + $0x10] sm:$0xff]  ;;  %v3353_v58 = vld [vmem:[%s3788_s2 + $0x8] sm:$0xff] }
  0x24   : > { %2500 = vmatprep.subr.mxu0 %v3017_v9  ;;  %2518 = vmatpush3.msra.mxu1 %v3115_v11  ;;  %v3360_v59 = vld [vmem:[%s3788_s2] sm:$0xff]  ;;  %v2263_v60 = vld [vmem:[%s3117_s24 + $0x30] sm:$0xff]  ;;  %v2265_v7 = vld [vmem:[%s3117_s24 + $0x38] sm:$0xff] }
  0x25   : > { %2501 = vmatpush3.msra.mxu0 %v3127_v13  ;;  %2519 = vmatprep.subr.mxu1 %v3017_v9  ;;  %v3461_v12 = vld [vmem:[%s3790_s4] ss:$0 sm:$0xff] }
  0x26   : > { %2502 = vmatprep.subr.mxu0 %v3017_v9  ;;  %2520 = vmatpush3.msra.mxu1 %v3127_v13 }
  0x27   : > { %2503 = vmatpush3.msra.mxu0 %v3136_v14  ;;  %2521 = vmatprep.subr.mxu1 %v3017_v9 }
  0x28   : > { %2504 = vmatprep.subr.mxu0 %v3017_v9  ;;  %2522 = vmatpush3.msra.mxu1 %v3136_v14 }
  0x29   : > { %2505 = vmatpush3.msra.mxu0 %v3145_v15  ;;  %2523 = vmatprep.subr.mxu1 %v3017_v9 }
  0x2a   : > { %2506 = vmatprep.subr.mxu0 %v3017_v9  ;;  %2524 = vmatpush3.msra.mxu1 %v3145_v15 }
  0x2b   : > { %2507 = vmatpush3.msra.mxu0 %v3154_v16  ;;  %2525 = vmatprep.subr.mxu1 %v3017_v9 }
  0x2c   : > { %2508 = vmatprep.subr.mxu0 %v3017_v9  ;;  %2526 = vmatpush3.msra.mxu1 %v3154_v16  ;;  %v2958_v18 = vpop.eup %2957 }
  0x2d   : > { %2509 = vmatpush3.msra.mxu0 %v3163_v17  ;;  %2527 = vmatprep.subr.mxu1 %v3017_v9  ;;  %354 = vst.msk [vmem:[#allocation2] sm:$0xff] %vm353_vm1, %v2958_v18 }
  0x2e   : > { %2528 = vmatpush3.msra.mxu1 %v3163_v17  ;;  %2529 = vmatprep.mubr.msk.f32.mxu1 %vm3018_vm0, %v3017_v9 }
  0x2f   : > { %2511 = vmatmul.mubr.msk.f32.vlgmr.msra.gmra.mxu0 %vm353_vm1, %v2958_v18  ;;  %2532 = vmatprep.subr.mxu0 %v3017_v9 }
  0x30   : > { %2533 = vmatpush3.msra.mxu0 %v3098_v8  ;;  %2548 = vmatprep.mubr.msk.f32.mxu0 %vm3018_vm0, %v3017_v9 }
  0x31   : > { %2534 = vmatprep.subr.mxu0 %v3017_v9  ;;  %2551 = vmatprep.subr.mxu1 %v3017_v9 }
  0x32   : > { %2535 = vmatpush3.msra.mxu0 %v3105_v10 }
  0x33   : > { %2536 = vmatprep.subr.mxu0 %v3017_v9 }
  0x34   : > { %2537 = vmatpush3.msra.mxu0 %v3115_v11 }
  0x35   : > { %2538 = vmatprep.subr.mxu0 %v3017_v9 }
  0x36   : > { %2539 = vmatpush3.msra.mxu0 %v3127_v13 }
  0x37   : > { %2540 = vmatprep.subr.mxu0 %v3017_v9 }
  0x38   : > { %2541 = vmatpush3.msra.mxu0 %v3136_v14 }
  0x39   : > { %2542 = vmatprep.subr.mxu0 %v3017_v9 }
  0x3a   : > { %2543 = vmatpush3.msra.mxu0 %v3145_v15 }
  0x3b   : > { %2544 = vmatprep.subr.mxu0 %v3017_v9 }
  0x3c   : > { %2545 = vmatpush3.msra.mxu0 %v3154_v16 }
  0x3d   : > { %2546 = vmatprep.subr.mxu0 %v3017_v9 }
  0x3e   : > { %2547 = vmatpush3.msra.mxu0 %v3163_v17 }
  0x3f   : > { %2570 = vmatprep.subr.mxu0 %v3017_v9 }
  0xef   : > { %v426_v20 = vpop.f32.mrf.mxu0 }
  0xf0   : > { %v427_v21 = vadd.f32 %v2253_v19, %v426_v20 }
  0xf1   : > { %v2512_v22 = vpop.f32.mrf.mxu0 }
  0xf2   : > { %2959 = vtanh.f32 %v427_v21 }
  0xff   : > { %v2960_v23 = vpop.eup %2959 }
 0x100   : > { %432 = vst.msk [vmem:[#allocation2 + $0x8] sm:$0xff] %vm353_vm1, %v2960_v23  ;;  %2530 = vmatmul.mubr.msk.f32.vlgmr.msra.gmra.mxu1 %vm353_vm1, %v2960_v23 }
 0x101   : > { %2552 = vmatpush3.msra.mxu1 %v3098_v8  ;;  %2567 = vmatprep.mubr.msk.f32.mxu1 %vm3018_vm0, %v3017_v9 }
 0x102   : > { %2553 = vmatprep.subr.mxu1 %v3017_v9 }
 0x103   : > { %2554 = vmatpush3.msra.mxu1 %v3105_v10 }
 0x104   : > { %2555 = vmatprep.subr.mxu1 %v3017_v9 }
 0x105   : > { %2556 = vmatpush3.msra.mxu1 %v3115_v11 }
 0x106   : > { %2557 = vmatprep.subr.mxu1 %v3017_v9 }
 0x107   : > { %2558 = vmatpush3.msra.mxu1 %v3127_v13  ;;  %v1005_v1 = vld [vmem:[#allocation2 + $0x8] sm:$0xff] }
 0x108   : > { %2559 = vmatprep.subr.mxu1 %v3017_v9 }
 0x109   : > { %2560 = vmatpush3.msra.mxu1 %v3136_v14 }
 0x10a   : > { %2561 = vmatprep.subr.mxu1 %v3017_v9 }
 0x10b   : > { %2562 = vmatpush3.msra.mxu1 %v3145_v15 }
 0x10c   : > { %2563 = vmatprep.subr.mxu1 %v3017_v9 }
 0x10d   : > { %2564 = vmatpush3.msra.mxu1 %v3154_v16 }
 0x10e   : > { %2565 = vmatprep.subr.mxu1 %v3017_v9 }
 0x10f   : > { %2566 = vmatpush3.msra.mxu1 %v3163_v17 }
 0x110   : > { %2589 = vmatprep.subr.mxu1 %v3017_v9 }
 0x1c0   : > { %v504_v25 = vpop.f32.mrf.mxu1 }
 0x1c1   : > { %v505_v26 = vadd.f32 %v2255_v24, %v504_v25 }
 0x1c2   : > { %v2531_v27 = vpop.f32.mrf.mxu1 }
 0x1c3   : > { %2961 = vtanh.f32 %v505_v26  ;;  %v3545_v26 = vld [vmem:[%s3789_s3 + $0x38] sm:$0xff]  ;;  %v3551_v27 = vld [vmem:[%s3789_s3 + $0x30] sm:$0xff] }
 0x1d0   : > { %v2962_v28 = vpop.eup %2961 }
 0x1d1   : > { %510 = vst.msk [vmem:[#allocation2 + $0x10] sm:$0xff] %vm353_vm1, %v2962_v28  ;;  %2549 = vmatmul.mubr.msk.f32.vlgmr.msra.gmra.mxu0 %vm353_vm1, %v2962_v28  ;;  %v3562_v28 = vld [vmem:[%s3789_s3 + $0x28] sm:$0xff] }
 0x1d2   : > { %2571 = vmatpush3.msra.mxu0 %v3098_v8  ;;  %2586 = vmatprep.mubr.msk.f32.mxu0 %vm3018_vm0, %v3017_v9 }
 0x1d3   : > { %2572 = vmatprep.subr.mxu0 %v3017_v9 }
 0x1d4   : > { %2573 = vmatpush3.msra.mxu0 %v3105_v10 }
 0x1d5   : > { %2574 = vmatprep.subr.mxu0 %v3017_v9 }
 0x1d6   : > { %2575 = vmatpush3.msra.mxu0 %v3115_v11 }
 0x1d7   : > { %2576 = vmatprep.subr.mxu0 %v3017_v9 }
 0x1d8   : > { %2577 = vmatpush3.msra.mxu0 %v3127_v13  ;;  %v3301_v50 = vld [vmem:[#allocation2 + $0x10] sm:$0xff] }
 0x1d9   : > { %2578 = vmatprep.subr.mxu0 %v3017_v9 }
 0x1da   : > { %2579 = vmatpush3.msra.mxu0 %v3136_v14 }
 0x1db   : > { %2580 = vmatprep.subr.mxu0 %v3017_v9 }
 0x1dc   : > { %2581 = vmatpush3.msra.mxu0 %v3145_v15 }
 0x1dd   : > { %2582 = vmatprep.subr.mxu0 %v3017_v9 }
 0x1de   : > { %2583 = vmatpush3.msra.mxu0 %v3154_v16 }
 0x1df   : > { %2584 = vmatprep.subr.mxu0 %v3017_v9 }
 0x1e0   : > { %2585 = vmatpush3.msra.mxu0 %v3163_v17 }
 0x1e1   : > { %2608 = vmatprep.subr.mxu0 %v3017_v9 }
 0x291   : > { %v582_v30 = vpop.f32.mrf.mxu0 }
 0x292   : > { %v583_v31 = vadd.f32 %v2257_v29, %v582_v30  ;;  %v3571_v29 = vld [vmem:[%s3789_s3 + $0x20] sm:$0xff]  ;;  %v3580_v30 = vld [vmem:[%s3789_s3 + $0x18] sm:$0xff] }
 0x293   : > { %v2550_v32 = vpop.f32.mrf.mxu0 }
 0x294   : > { %2963 = vtanh.f32 %v583_v31  ;;  %v3587_v31 = vld [vmem:[%s3789_s3 + $0x10] sm:$0xff]  ;;  %v3594_v32 = vld [vmem:[%s3789_s3 + $0x8] sm:$0xff] }
 0x2a1   : > { %v2964_v33 = vpop.eup %2963 }
 0x2a2   : > { %588 = vst.msk [vmem:[#allocation2 + $0x18] sm:$0xff] %vm353_vm1, %v2964_v33  ;;  %2568 = vmatmul.mubr.msk.f32.vlgmr.msra.gmra.mxu1 %vm353_vm1, %v2964_v33  ;;  %v3603_v33 = vld [vmem:[%s3789_s3] sm:$0xff] }
 0x2a3   : > { %2590 = vmatpush3.msra.mxu1 %v3098_v8  ;;  %2605 = vmatprep.mubr.msk.f32.mxu1 %vm3018_vm0, %v3017_v9 }
 0x2a4   : > { %2591 = vmatprep.subr.mxu1 %v3017_v9 }
 0x2a5   : > { %2592 = vmatpush3.msra.mxu1 %v3105_v10 }
 0x2a6   : > { %2593 = vmatprep.subr.mxu1 %v3017_v9 }
 0x2a7   : > { %2594 = vmatpush3.msra.mxu1 %v3115_v11 }
 0x2a8   : > { %2595 = vmatprep.subr.mxu1 %v3017_v9 }
 0x2a9   : > { %2596 = vmatpush3.msra.mxu1 %v3127_v13  ;;  %v3275_v41 = vld [vmem:[#allocation2 + $0x18] sm:$0xff] }
 0x2aa   : > { %2597 = vmatprep.subr.mxu1 %v3017_v9 }
 0x2ab   : > { %2598 = vmatpush3.msra.mxu1 %v3136_v14 }
 0x2ac   : > { %2599 = vmatprep.subr.mxu1 %v3017_v9 }
 0x2ad   : > { %2600 = vmatpush3.msra.mxu1 %v3145_v15 }
 0x2ae   : > { %2601 = vmatprep.subr.mxu1 %v3017_v9 }
 0x2af   : > { %2602 = vmatpush3.msra.mxu1 %v3154_v16 }
 0x2b0   : > { %2603 = vmatprep.subr.mxu1 %v3017_v9 }
 0x2b1   : > { %2604 = vmatpush3.msra.mxu1 %v3163_v17 }
 0x2b2   : > { %2627 = vmatprep.subr.mxu1 %v3017_v9 }
 0x362   : > { %v660_v35 = vpop.f32.mrf.mxu1 }
 0x363   : > { %v661_v36 = vadd.f32 %v2259_v34, %v660_v35 }
 0x364   : > { %v2569_v37 = vpop.f32.mrf.mxu1 }
 0x365   : > { %2965 = vtanh.f32 %v661_v36 }
 0x372   : > { %v2966_v39 = vpop.eup %2965 }
 0x373   : > { %666 = vst.msk [vmem:[#allocation2 + $0x20] sm:$0xff] %vm353_vm1, %v2966_v39  ;;  %2587 = vmatmul.mubr.msk.f32.vlgmr.msra.gmra.mxu0 %vm353_vm1, %v2966_v39 }
 0x374   : > { %2609 = vmatpush3.msra.mxu0 %v3098_v8  ;;  %2624 = vmatprep.mubr.msk.f32.mxu0 %vm3018_vm0, %v3017_v9 }
 0x375   : > { %2610 = vmatprep.subr.mxu0 %v3017_v9 }
 0x376   : > { %2611 = vmatpush3.msra.mxu0 %v3105_v10 }
 0x377   : > { %2612 = vmatprep.subr.mxu0 %v3017_v9 }
 0x378   : > { %2613 = vmatpush3.msra.mxu0 %v3115_v11 }
 0x379   : > { %2614 = vmatprep.subr.mxu0 %v3017_v9 }
 0x37a   : > { %2615 = vmatpush3.msra.mxu0 %v3127_v13  ;;  %v3277_v42 = vld [vmem:[#allocation2 + $0x20] sm:$0xff] }
 0x37b   : > { %2616 = vmatprep.subr.mxu0 %v3017_v9  ;;  %v3284_v43 = vsel %vm342_vm2, %v3277_v42, %v3275_v41  ;;  %v1167_v5 = vsel %vm342_vm2, %v3275_v41, %v3277_v42 }
 0x37c   : > { %2617 = vmatpush3.msra.mxu0 %v3136_v14 }
 0x37d   : > { %2618 = vmatprep.subr.mxu0 %v3017_v9 }
 0x37e   : > { %2619 = vmatpush3.msra.mxu0 %v3145_v15 }
 0x37f   : > { %2620 = vmatprep.subr.mxu0 %v3017_v9 }
 0x380   : > { %2621 = vmatpush3.msra.mxu0 %v3154_v16 }
 0x381   : > { %2622 = vmatprep.subr.mxu0 %v3017_v9 }
 0x382   : > { %2623 = vmatpush3.msra.mxu0 %v3163_v17  ;;  %v924_v17 = vld [vmem:[#allocation2] sm:$0xff] }
 0x383   : > { %2646 = vmatprep.subr.mxu0 %v3017_v9 }
 0x433   : > { %v738_v45 = vpop.f32.mrf.mxu0 }
 0x434   : > { %v739_v46 = vadd.f32 %v2261_v44, %v738_v45 }
 0x435   : > { %v2588_v47 = vpop.f32.mrf.mxu0 }
 0x436   : > { %2967 = vtanh.f32 %v739_v46 }
 0x443   : > { %v2968_v48 = vpop.eup %2967 }
 0x444   : > { %744 = vst.msk [vmem:[#allocation2 + $0x28] sm:$0xff] %vm353_vm1, %v2968_v48  ;;  %2606 = vmatmul.mubr.msk.f32.vlgmr.msra.gmra.mxu1 %vm353_vm1, %v2968_v48 }
 0x445   : > { %2643 = vmatprep.mubr.msk.f32.mxu1 %vm3018_vm0, %v3017_v9  ;;  %2628 = vmatpush3.msra.mxu1 %v3312_v52 }
 0x446   : > { %2629 = vmatprep.subr.mxu1 %v3017_v9 }
 0x447   : > { %2630 = vmatpush3.msra.mxu1 %v3319_v53 }
 0x448   : > { %2631 = vmatprep.subr.mxu1 %v3017_v9 }
 0x449   : > { %2632 = vmatpush3.msra.mxu1 %v3325_v54 }
 0x44a   : > { %2633 = vmatprep.subr.mxu1 %v3017_v9 }
 0x44b   : > { %v3299_v49 = vld [vmem:[#allocation2 + $0x28] sm:$0xff]  ;;  %2634 = vmatpush3.msra.mxu1 %v3332_v55 }
 0x44c   : > { %v3307_v51 = vsel %vm342_vm2, %v3301_v50, %v3299_v49  ;;  %2635 = vmatprep.subr.mxu1 %v3017_v9  ;;  %v1325_v6 = vsel %vm342_vm2, %v3299_v49, %v3301_v50 }
 0x44d   : > { %2636 = vmatpush3.msra.mxu1 %v3339_v56 }
 0x44e   : > { %2637 = vmatprep.subr.mxu1 %v3017_v9 }
 0x44f   : > { %2638 = vmatpush3.msra.mxu1 %v3346_v57 }
 0x450   : > { %2639 = vmatprep.subr.mxu1 %v3017_v9 }
 0x451   : > { %2640 = vmatpush3.msra.mxu1 %v3353_v58 }
 0x452   : > { %2641 = vmatprep.subr.mxu1 %v3017_v9 }
 0x453   : > { %2642 = vmatpush3.msra.mxu1 %v3360_v59 }
 0x454   : > { %2665 = vmatprep.subr.mxu1 %v3017_v9 }
 0x504   : > { %v816_v61 = vpop.f32.mrf.mxu1 }
 0x505   : > { %v817_v62 = vadd.f32 %v2263_v60, %v816_v61 }
 0x506   : > { %v2607_v63 = vpop.f32.mrf.mxu1 }
 0x507   : > { %2969 = vtanh.f32 %v817_v62 }
 0x514   : > { %v2970_v0 = vpop.eup %2969 }
 0x515   : > { %822 = vst.msk [vmem:[#allocation2 + $0x30] sm:$0xff] %vm353_vm1, %v2970_v0  ;;  %2625 = vmatmul.mubr.msk.f32.vlgmr.msra.gmra.mxu0 %vm353_vm1, %v2970_v0 }
 0x516   : > { %2647 = vmatpush3.msra.mxu0 %v3312_v52  ;;  %2662 = vmatprep.mubr.msk.f32.mxu0 %vm3018_vm0, %v3017_v9 }
 0x517   : > { %2648 = vmatprep.subr.mxu0 %v3017_v9 }
 0x518   : > { %2649 = vmatpush3.msra.mxu0 %v3319_v53 }
 0x519   : > { %2650 = vmatprep.subr.mxu0 %v3017_v9 }
 0x51a   : > { %2651 = vmatpush3.msra.mxu0 %v3325_v54 }
 0x51b   : > { %2652 = vmatprep.subr.mxu0 %v3017_v9 }
 0x51c   : > { %2653 = vmatpush3.msra.mxu0 %v3332_v55  ;;  %v1006_v2 = vld [vmem:[#allocation2 + $0x30] sm:$0xff] }
 0x51d   : > { %2654 = vmatprep.subr.mxu0 %v3017_v9  ;;  %v3380_v3 = vsel %vm342_vm2, %v1006_v2, %v1005_v1  ;;  %v1007_v4 = vsel %vm342_vm2, %v1005_v1, %v1006_v2 }
 0x51e   : > { %2655 = vmatpush3.msra.mxu0 %v3339_v56 }
 0x51f   : > { %2656 = vmatprep.subr.mxu0 %v3017_v9 }
 0x520   : > { %2657 = vmatpush3.msra.mxu0 %v3346_v57 }
 0x521   : > { %2658 = vmatprep.subr.mxu0 %v3017_v9 }
 0x522   : > { %2659 = vmatpush3.msra.mxu0 %v3353_v58 }
 0x523   : > { %2660 = vmatprep.subr.mxu0 %v3017_v9 }
 0x524   : > { %2661 = vmatpush3.msra.mxu0 %v3360_v59 }
 0x525   : > { %2663 = vmatmul.mubr.msk.f32.vlgmr.msra.gmra.mxu0 %vm353_vm1, %v1007_v4  ;;  %2684 = vmatprep.subr.mxu0 %v3017_v9 }
 0x526   : > { %2685 = vmatpush3.msra.mxu0 %v3312_v52  ;;  %2700 = vmatprep.mubr.msk.f32.mxu0 %vm3018_vm0, %v3017_v9 }
 0x527   : > { %2686 = vmatprep.subr.mxu0 %v3017_v9 }
 0x528   : > { %2687 = vmatpush3.msra.mxu0 %v3319_v53 }
 0x529   : > { %2688 = vmatprep.subr.mxu0 %v3017_v9 }
 0x52a   : > { %2689 = vmatpush3.msra.mxu0 %v3325_v54 }
 0x52b   : > { %2690 = vmatprep.subr.mxu0 %v3017_v9 }
 0x52c   : > { %2691 = vmatpush3.msra.mxu0 %v3332_v55 }
 0x52d   : > { %2692 = vmatprep.subr.mxu0 %v3017_v9 }
 0x52e   : > { %2693 = vmatpush3.msra.mxu0 %v3339_v56 }
 0x52f   : > { %2694 = vmatprep.subr.mxu0 %v3017_v9 }
 0x530   : > { %2695 = vmatpush3.msra.mxu0 %v3346_v57 }
 0x531   : > { %2696 = vmatprep.subr.mxu0 %v3017_v9 }
 0x532   : > { %2697 = vmatpush3.msra.mxu0 %v3353_v58 }
 0x533   : > { %2698 = vmatprep.subr.mxu0 %v3017_v9 }
 0x534   : > { %2699 = vmatpush3.msra.mxu0 %v3360_v59 }
 0x535   : > { %2701 = vmatmul.mubr.msk.f32.vlgmr.msra.gmra.mxu0 %vm353_vm1, %v1167_v5  ;;  %2722 = vmatprep.subr.mxu0 %v3017_v9 }
 0x536   : > { %2723 = vmatpush3.msra.mxu0 %v3312_v52  ;;  %2738 = vmatprep.mubr.msk.f32.mxu0 %vm3018_vm0, %v3017_v9 }
 0x537   : > { %2724 = vmatprep.subr.mxu0 %v3017_v9 }
 0x538   : > { %2725 = vmatpush3.msra.mxu0 %v3319_v53 }
 0x539   : > { %2726 = vmatprep.subr.mxu0 %v3017_v9 }
 0x53a   : > { %2727 = vmatpush3.msra.mxu0 %v3325_v54 }
 0x53b   : > { %2728 = vmatprep.subr.mxu0 %v3017_v9 }
 0x53c   : > { %2729 = vmatpush3.msra.mxu0 %v3332_v55 }
 0x53d   : > { %2730 = vmatprep.subr.mxu0 %v3017_v9 }
 0x53e   : > { %2731 = vmatpush3.msra.mxu0 %v3339_v56 }
 0x53f   : > { %2732 = vmatprep.subr.mxu0 %v3017_v9 }
 0x540   : > { %2733 = vmatpush3.msra.mxu0 %v3346_v57 }
 0x541   : > { %2734 = vmatprep.subr.mxu0 %v3017_v9 }
 0x542   : > { %2735 = vmatpush3.msra.mxu0 %v3353_v58 }
 0x543   : > { %2736 = vmatprep.subr.mxu0 %v3017_v9 }
 0x544   : > { %2737 = vmatpush3.msra.mxu0 %v3360_v59 }
 0x545   : > { %2739 = vmatmul.mubr.msk.f32.vlgmr.msra.gmra.mxu0 %vm353_vm1, %v1325_v6  ;;  %2760 = vmatprep.subr.mxu0 %v3017_v9 }
 0x546   : > { %2761 = vmatpush3.msra.mxu0 %v3312_v52  ;;  %2776 = vmatprep.mubr.msk.f32.mxu0 %vm3018_vm0, %v3017_v9 }
 0x547   : > { %2762 = vmatprep.subr.mxu0 %v3017_v9 }
 0x548   : > { %2763 = vmatpush3.msra.mxu0 %v3319_v53 }
 0x549   : > { %2764 = vmatprep.subr.mxu0 %v3017_v9 }
 0x54a   : > { %2765 = vmatpush3.msra.mxu0 %v3325_v54 }
 0x54b   : > { %2766 = vmatprep.subr.mxu0 %v3017_v9 }
 0x54c   : > { %2767 = vmatpush3.msra.mxu0 %v3332_v55 }
 0x54d   : > { %2768 = vmatprep.subr.mxu0 %v3017_v9 }
 0x54e   : > { %2769 = vmatpush3.msra.mxu0 %v3339_v56 }
 0x54f   : > { %2770 = vmatprep.subr.mxu0 %v3017_v9 }
 0x550   : > { %2771 = vmatpush3.msra.mxu0 %v3346_v57 }
 0x551   : > { %2772 = vmatprep.subr.mxu0 %v3017_v9 }
 0x552   : > { %2773 = vmatpush3.msra.mxu0 %v3353_v58 }
 0x553   : > { %2774 = vmatprep.subr.mxu0 %v3017_v9 }
 0x554   : > { %2775 = vmatpush3.msra.mxu0 %v3360_v59 }
 0x555   : > { %2798 = vmatprep.subr.mxu0 %v3017_v9 }
 0x5d5   : > { %v894_v8 = vpop.f32.mrf.mxu0 }
 0x5d6   : > { %v895_v10 = vadd.f32 %v2265_v7, %v894_v8 }
 0x5d7   : > { %v2626_v11 = vpop.f32.mrf.mxu0 }
 0x5d8   : > { %2971 = vtanh.f32 %v895_v10 }
 0x5e5   : > { %v2972_v13 = vpop.eup %2971  ;;  %v1077_v14 = vpop.f32.mrf.mxu0 }
 0x5e6   : > { %900 = vst.msk [vmem:[#allocation2 + $0x38] sm:$0xff] %vm353_vm1, %v2972_v13  ;;  %v1078_v15 = vadd.f32 %v3461_v12, %v1077_v14 }
 0x5e7   : > { %v2664_v16 = vpop.f32.mrf.mxu0 }
 0x5e8   : > { %1082 = vst.msk [vmem:[#allocation3 + $0x8] sm:$0xff] %vm1000_vm3, %v1078_v15 }
 0x5e9   : > { %1084 = vst.msk [vmem:[#allocation3 + $0x30] sm:$0xff] %vm1003_vm4, %v1078_v15 }
 0x5ed   : > { %v925_v18 = vld [vmem:[#allocation2 + $0x38] sm:$0xff] }
 0x5ee   : > { %v926_v19 = vsel %vm342_vm2, %v924_v17, %v925_v18  ;;  %v1481_v20 = vsel %vm342_vm2, %v925_v18, %v924_v17 }
 0x5ef   : > { %2644 = vmatmul.mubr.msk.f32.vlgmr.msra.gmra.mxu1 %vm353_vm1, %v926_v19  ;;  %2777 = vmatmul.mubr.msk.f32.vlgmr.msra.gmra.mxu0 %vm353_vm1, %v1481_v20  ;;  %v2091_v19 = vld [vmem:[%s3791_s5 + $0x38] sm:$0xff]  ;;  %v2090_v20 = vld [vmem:[%s3791_s5 + $0x30] sm:$0xff] }
 0x5f0   : > { %2666 = vmatpush3.msra.mxu1 %v3312_v52  ;;  %2681 = vmatprep.mubr.msk.f32.mxu1 %vm3018_vm0, %v3017_v9 }
 0x5f1   : > { %2667 = vmatprep.subr.mxu1 %v3017_v9  ;;  %2814 = vmatprep.mubr.msk.f32.mxu0 %vm3018_vm0, %v3017_v9 }
 0x5f2   : > { %2668 = vmatpush3.msra.mxu1 %v3319_v53  ;;  %2799 = vmatpush3.msra.mxu0 %v3545_v26 }
 0x5f3   : > { %2669 = vmatprep.subr.mxu1 %v3017_v9  ;;  %2800 = vmatprep.subr.mxu0 %v3017_v9 }
 0x5f4   : > { %2670 = vmatpush3.msra.mxu1 %v3325_v54  ;;  %2801 = vmatpush3.msra.mxu0 %v3551_v27 }
 0x5f5   : > { %2671 = vmatprep.subr.mxu1 %v3017_v9  ;;  %v1237_v21 = vpop.f32.mrf.mxu0  ;;  %2802 = vmatprep.subr.mxu0 %v3017_v9 }
 0x5f6   : > { %v1238_v22 = vadd.f32 %v3461_v12, %v1237_v21  ;;  %2672 = vmatpush3.msra.mxu1 %v3332_v55  ;;  %2803 = vmatpush3.msra.mxu0 %v3562_v28  ;;  %v2089_v21 = vld [vmem:[%s3791_s5 + $0x28] sm:$0xff] }
 0x5f7   : > { %2673 = vmatprep.subr.mxu1 %v3017_v9  ;;  %v2702_v23 = vpop.f32.mrf.mxu0  ;;  %2804 = vmatprep.subr.mxu0 %v3017_v9 }
 0x5f8   : > { %1242 = vst.msk [vmem:[#allocation3 + $0x18] sm:$0xff] %vm1000_vm3, %v1238_v22  ;;  %2674 = vmatpush3.msra.mxu1 %v3339_v56  ;;  %2805 = vmatpush3.msra.mxu0 %v3571_v29  ;;  %v2087_v23 = vld [vmem:[%s3791_s5 + $0x18] sm:$0xff] }
 0x5f9   : > { %1244 = vst.msk [vmem:[#allocation3 + $0x20] sm:$0xff] %vm1003_vm4, %v1238_v22  ;;  %2675 = vmatprep.subr.mxu1 %v3017_v9  ;;  %2806 = vmatprep.subr.mxu0 %v3017_v9  ;;  %v2088_v22 = vld [vmem:[%s3791_s5 + $0x20] sm:$0xff] }
 0x5fa   : > { %2676 = vmatpush3.msra.mxu1 %v3346_v57  ;;  %2807 = vmatpush3.msra.mxu0 %v3580_v30 }
 0x5fb   : > { %2677 = vmatprep.subr.mxu1 %v3017_v9  ;;  %2808 = vmatprep.subr.mxu0 %v3017_v9 }
 0x5fc   : > { %2678 = vmatpush3.msra.mxu1 %v3353_v58  ;;  %2809 = vmatpush3.msra.mxu0 %v3587_v31 }
 0x5fd   : > { %2679 = vmatprep.subr.mxu1 %v3017_v9  ;;  %2810 = vmatprep.subr.mxu0 %v3017_v9 }
 0x5fe   : > { %2680 = vmatpush3.msra.mxu1 %v3360_v59  ;;  %2811 = vmatpush3.msra.mxu0 %v3594_v32 }
 0x5ff   : > { %2682 = vmatmul.mubr.msk.f32.vlgmr.msra.gmra.mxu1 %vm353_vm1, %v3307_v51  ;;  %2703 = vmatprep.subr.mxu1 %v3017_v9 }
 0x600   : > { %2704 = vmatpush3.msra.mxu1 %v3312_v52  ;;  %2719 = vmatprep.mubr.msk.f32.mxu1 %vm3018_vm0, %v3017_v9 }
 0x601   : > { %2705 = vmatprep.subr.mxu1 %v3017_v9  ;;  %2812 = vmatprep.subr.mxu0 %v3017_v9 }
 0x602   : > { %2706 = vmatpush3.msra.mxu1 %v3319_v53  ;;  %2813 = vmatpush3.msra.mxu0 %v3603_v33 }
 0x603   : > { %2707 = vmatprep.subr.mxu1 %v3017_v9  ;;  %2836 = vmatprep.subr.mxu0 %v3017_v9 }
 0x604   : > { %2708 = vmatpush3.msra.mxu1 %v3325_v54 }
 0x605   : > { %2709 = vmatprep.subr.mxu1 %v3017_v9  ;;  %v3506_v24 = vpop.f32.mrf.mxu0 }
 0x606   : > { %2710 = vmatpush3.msra.mxu1 %v3332_v55 }
 0x607   : > { %2711 = vmatprep.subr.mxu1 %v3017_v9  ;;  %v2740_v25 = vpop.f32.mrf.mxu0 }
 0x608   : > { %2712 = vmatpush3.msra.mxu1 %v3339_v56  ;;  %v2085_v25 = vld [vmem:[%s3791_s5 + $0x8] sm:$0xff] }
 0x609   : > { %2713 = vmatprep.subr.mxu1 %v3017_v9 }
 0x60a   : > { %2714 = vmatpush3.msra.mxu1 %v3346_v57 }
 0x60b   : > { %2715 = vmatprep.subr.mxu1 %v3017_v9 }
 0x60c   : > { %2716 = vmatpush3.msra.mxu1 %v3353_v58 }
 0x60d   : > { %2717 = vmatprep.subr.mxu1 %v3017_v9 }
 0x60e   : > { %2718 = vmatpush3.msra.mxu1 %v3360_v59 }
 0x60f   : > { %2720 = vmatmul.mubr.msk.f32.vlgmr.msra.gmra.mxu1 %vm353_vm1, %v3284_v43  ;;  %2741 = vmatprep.subr.mxu1 %v3017_v9  ;;  %v1396_v43 = vadd.f32 %v3461_v12, %v3506_v24  ;;  %v2086_v24 = vld [vmem:[%s3791_s5 + $0x10] sm:$0xff] }
 0x610   : > { %2742 = vmatpush3.msra.mxu1 %v3312_v52  ;;  %2757 = vmatprep.mubr.msk.f32.mxu1 %vm3018_vm0, %v3017_v9 }
 0x611   : > { %2743 = vmatprep.subr.mxu1 %v3017_v9 }
 0x612   : > { %2744 = vmatpush3.msra.mxu1 %v3319_v53 }
 0x613   : > { %2745 = vmatprep.subr.mxu1 %v3017_v9 }
 0x614   : > { %2746 = vmatpush3.msra.mxu1 %v3325_v54 }
 0x615   : > { %2747 = vmatprep.subr.mxu1 %v3017_v9 }
 0x616   : > { %2748 = vmatpush3.msra.mxu1 %v3332_v55 }
 0x617   : > { %2749 = vmatprep.subr.mxu1 %v3017_v9 }
 0x618   : > { %2750 = vmatpush3.msra.mxu1 %v3339_v56 }
 0x619   : > { %2751 = vmatprep.subr.mxu1 %v3017_v9 }
 0x61a   : > { %2752 = vmatpush3.msra.mxu1 %v3346_v57 }
 0x61b   : > { %2753 = vmatprep.subr.mxu1 %v3017_v9 }
 0x61c   : > { %2754 = vmatpush3.msra.mxu1 %v3353_v58 }
 0x61d   : > { %2755 = vmatprep.subr.mxu1 %v3017_v9 }
 0x61e   : > { %2756 = vmatpush3.msra.mxu1 %v3360_v59 }
 0x61f   : > { %2758 = vmatmul.mubr.msk.f32.vlgmr.msra.gmra.mxu1 %vm353_vm1, %v3380_v3  ;;  %2779 = vmatprep.subr.mxu1 %v3017_v9 }
 0x620   : > { %2795 = vmatprep.mubr.msk.f32.mxu1 %vm3018_vm0, %v3017_v9  ;;  %2780 = vmatpush3.msra.mxu1 %v3545_v26 }
 0x621   : > { %2781 = vmatprep.subr.mxu1 %v3017_v9 }
 0x622   : > { %2782 = vmatpush3.msra.mxu1 %v3551_v27 }
 0x623   : > { %2783 = vmatprep.subr.mxu1 %v3017_v9 }
 0x624   : > { %2784 = vmatpush3.msra.mxu1 %v3562_v28 }
 0x625   : > { %2785 = vmatprep.subr.mxu1 %v3017_v9 }
 0x626   : > { %2786 = vmatpush3.msra.mxu1 %v3571_v29 }
 0x627   : > { %2787 = vmatprep.subr.mxu1 %v3017_v9 }
 0x628   : > { %2788 = vmatpush3.msra.mxu1 %v3580_v30 }
 0x629   : > { %2789 = vmatprep.subr.mxu1 %v3017_v9 }
 0x62a   : > { %2790 = vmatpush3.msra.mxu1 %v3587_v31 }
 0x62b   : > { %2791 = vmatprep.subr.mxu1 %v3017_v9 }
 0x62c   : > { %2792 = vmatpush3.msra.mxu1 %v3594_v32 }
 0x62d   : > { %2793 = vmatprep.subr.mxu1 %v3017_v9 }
 0x62e   : > { %2794 = vmatpush3.msra.mxu1 %v3603_v33 }
 0x62f   : > { %2817 = vmatprep.subr.mxu1 %v3017_v9 }
 0x6af   : > { %v996_v34 = vpop.f32.mrf.mxu1  ;;  %v1551_v35 = vpop.f32.mrf.mxu0 }
 0x6b0   : > { %v997_v36 = vadd.f32 %v3461_v12, %v996_v34  ;;  %v1552_v37 = vadd.f32 %v3461_v12, %v1551_v35 }
 0x6b1   : > { %v2645_v38 = vpop.f32.mrf.mxu1  ;;  %v2778_v39 = vpop.f32.mrf.mxu0 }
 0x6b2   : > { %1001 = vst.msk [vmem:[#allocation3] sm:$0xff] %vm1000_vm3, %v997_v36 }
 0x6b3   : > { %1004 = vst.msk [vmem:[#allocation3 + $0x38] sm:$0xff] %vm1003_vm4, %v997_v36  ;;  %1556 = vst.msk [vmem:[#allocation3] sm:$0xff] %vm1003_vm4, %v1552_v37 }
 0x6b4   : > { %1555 = vst.msk [vmem:[#allocation3 + $0x38] sm:$0xff] %vm1000_vm3, %v1552_v37 }
 0x6ba   : > { %v1557_v40 = vld [vmem:[#allocation3] sm:$0xff] }
 0x6bb   : > { %2973 = vtanh.f32 %v1557_v40 }
 0x6bf   : > { %v1157_v41 = vpop.f32.mrf.mxu1 }
 0x6c0   : > { %v1158_v42 = vadd.f32 %v3461_v12, %v1157_v41 }
 0x6c1   : > { %v2683_v44 = vpop.f32.mrf.mxu1 }
 0x6c2   : > { %1162 = vst.msk [vmem:[#allocation3 + $0x10] sm:$0xff] %vm1000_vm3, %v1158_v42 }
 0x6c3   : > { %1164 = vst.msk [vmem:[#allocation3 + $0x28] sm:$0xff] %vm1003_vm4, %v1158_v42  ;;  %1400 = vst.msk [vmem:[#allocation3 + $0x10] sm:$0xff] %vm1003_vm4, %v1396_v43 }
 0x6c4   : > { %1399 = vst.msk [vmem:[#allocation3 + $0x28] sm:$0xff] %vm1000_vm3, %v1396_v43 }
 0x6c8   : > { %v2974_v45 = vpop.eup %2973 }
 0x6c9   : > { %2796 = vmatmul.mubr.msk.f32.vlgmr.msra.gmra.mxu1 %vm353_vm1, %v2974_v45 }
 0x6ca   : > { %2818 = vmatpush3.msra.mxu1 %v3545_v26  ;;  %2833 = vmatprep.mubr.msk.f32.mxu1 %vm3018_vm0, %v3017_v9  ;;  %v1634_v57 = vld [vmem:[#allocation3 + $0x10] sm:$0xff] }
 0x6cb   : > { %2819 = vmatprep.subr.mxu1 %v3017_v9  ;;  %v1859_v8 = vld [vmem:[#allocation3 + $0x28] sm:$0xff] }
 0x6cc   : > { %2820 = vmatpush3.msra.mxu1 %v3551_v27 }
 0x6cd   : > { %2821 = vmatprep.subr.mxu1 %v3017_v9 }
 0x6ce   : > { %2822 = vmatpush3.msra.mxu1 %v3562_v28 }
 0x6cf   : > { %v1317_v46 = vpop.f32.mrf.mxu1  ;;  %2823 = vmatprep.subr.mxu1 %v3017_v9 }
 0x6d0   : > { %v1318_v47 = vadd.f32 %v3461_v12, %v1317_v46  ;;  %2824 = vmatpush3.msra.mxu1 %v3571_v29 }
 0x6d1   : > { %v2721_v48 = vpop.f32.mrf.mxu1  ;;  %2825 = vmatprep.subr.mxu1 %v3017_v9 }
 0x6d2   : > { %1321 = vst.msk [vmem:[#allocation3 + $0x20] sm:$0xff] %vm1000_vm3, %v1318_v47  ;;  %2826 = vmatpush3.msra.mxu1 %v3580_v30 }
 0x6d3   : > { %1322 = vst.msk [vmem:[#allocation3 + $0x18] sm:$0xff] %vm1003_vm4, %v1318_v47  ;;  %2827 = vmatprep.subr.mxu1 %v3017_v9 }
 0x6d4   : > { %2828 = vmatpush3.msra.mxu1 %v3587_v31 }
 0x6d5   : > { %2829 = vmatprep.subr.mxu1 %v3017_v9 }
 0x6d6   : > { %2830 = vmatpush3.msra.mxu1 %v3594_v32 }
 0x6d7   : > { %2831 = vmatprep.subr.mxu1 %v3017_v9 }
 0x6d8   : > { %2832 = vmatpush3.msra.mxu1 %v3603_v33 }
 0x6d9   : > { %2855 = vmatprep.subr.mxu1 %v3017_v9  ;;  %v1784_v3 = vld [vmem:[#allocation3 + $0x20] sm:$0xff] }
 0x6da   : > { %v1709_v62 = vld [vmem:[#allocation3 + $0x18] sm:$0xff] }
 0x6df   : > { %v1473_v49 = vpop.f32.mrf.mxu1 }
 0x6e0   : > { %v1474_v50 = vadd.f32 %v3461_v12, %v1473_v49 }
 0x6e1   : > { %v2759_v51 = vpop.f32.mrf.mxu1 }
 0x6e2   : > { %1477 = vst.msk [vmem:[#allocation3 + $0x30] sm:$0xff] %vm1000_vm3, %v1474_v50 }
 0x6e3   : > { %1478 = vst.msk [vmem:[#allocation3 + $0x8] sm:$0xff] %vm1003_vm4, %v1474_v50 }
 0x6e9   : > { %v1934_v14 = vld [vmem:[#allocation3 + $0x30] sm:$0xff] }
 0x6ea   : > { %v1559_v52 = vld [vmem:[#allocation3 + $0x8] sm:$0xff] }
 0x789   : > { %v1629_v53 = vpop.f32.mrf.mxu1 }
 0x78a   : > { %v1630_v54 = vadd.f32 %v1629_v53, %v1559_v52 }
 0x78b   : > { %v2797_v55 = vpop.f32.mrf.mxu1 }
 0x78c   : > { %2975 = vtanh.f32 %v1630_v54 }
 0x799   : > { %v2976_v56 = vpop.eup %2975 }
 0x79a   : > { %2815 = vmatmul.mubr.msk.f32.vlgmr.msra.gmra.mxu0 %vm353_vm1, %v2976_v56 }
 0x79b   : > { %2837 = vmatpush3.msra.mxu0 %v3545_v26  ;;  %2852 = vmatprep.mubr.msk.f32.mxu0 %vm3018_vm0, %v3017_v9 }
 0x79c   : > { %2838 = vmatprep.subr.mxu0 %v3017_v9 }
 0x79d   : > { %2839 = vmatpush3.msra.mxu0 %v3551_v27 }
 0x79e   : > { %2840 = vmatprep.subr.mxu0 %v3017_v9 }
 0x79f   : > { %2841 = vmatpush3.msra.mxu0 %v3562_v28 }
 0x7a0   : > { %2842 = vmatprep.subr.mxu0 %v3017_v9 }
 0x7a1   : > { %2843 = vmatpush3.msra.mxu0 %v3571_v29 }
 0x7a2   : > { %2844 = vmatprep.subr.mxu0 %v3017_v9 }
 0x7a3   : > { %2845 = vmatpush3.msra.mxu0 %v3580_v30 }
 0x7a4   : > { %2846 = vmatprep.subr.mxu0 %v3017_v9 }
 0x7a5   : > { %2847 = vmatpush3.msra.mxu0 %v3587_v31 }
 0x7a6   : > { %2848 = vmatprep.subr.mxu0 %v3017_v9 }
 0x7a7   : > { %2849 = vmatpush3.msra.mxu0 %v3594_v32 }
 0x7a8   : > { %2850 = vmatprep.subr.mxu0 %v3017_v9 }
 0x7a9   : > { %2851 = vmatpush3.msra.mxu0 %v3603_v33 }
 0x7aa   : > { %2874 = vmatprep.subr.mxu0 %v3017_v9 }
 0x85a   : > { %v1704_v58 = vpop.f32.mrf.mxu0 }
 0x85b   : > { %v1705_v59 = vadd.f32 %v1704_v58, %v1634_v57 }
 0x85c   : > { %v2816_v60 = vpop.f32.mrf.mxu0 }
 0x85d   : > { %2977 = vtanh.f32 %v1705_v59 }
 0x86a   : > { %v2978_v61 = vpop.eup %2977 }
 0x86b   : > { %2834 = vmatmul.mubr.msk.f32.vlgmr.msra.gmra.mxu1 %vm353_vm1, %v2978_v61 }
 0x86c   : > { %2856 = vmatpush3.msra.mxu1 %v3545_v26  ;;  %2871 = vmatprep.mubr.msk.f32.mxu1 %vm3018_vm0, %v3017_v9 }
 0x86d   : > { %2857 = vmatprep.subr.mxu1 %v3017_v9 }
 0x86e   : > { %2858 = vmatpush3.msra.mxu1 %v3551_v27 }
 0x86f   : > { %2859 = vmatprep.subr.mxu1 %v3017_v9 }
 0x870   : > { %2860 = vmatpush3.msra.mxu1 %v3562_v28 }
 0x871   : > { %2861 = vmatprep.subr.mxu1 %v3017_v9 }
 0x872   : > { %2862 = vmatpush3.msra.mxu1 %v3571_v29 }
 0x873   : > { %2863 = vmatprep.subr.mxu1 %v3017_v9 }
 0x874   : > { %2864 = vmatpush3.msra.mxu1 %v3580_v30 }
 0x875   : > { %2865 = vmatprep.subr.mxu1 %v3017_v9 }
 0x876   : > { %2866 = vmatpush3.msra.mxu1 %v3587_v31 }
 0x877   : > { %2867 = vmatprep.subr.mxu1 %v3017_v9 }
 0x878   : > { %2868 = vmatpush3.msra.mxu1 %v3594_v32 }
 0x879   : > { %2869 = vmatprep.subr.mxu1 %v3017_v9 }
 0x87a   : > { %2870 = vmatpush3.msra.mxu1 %v3603_v33 }
 0x87b   : > { %2893 = vmatprep.subr.mxu1 %v3017_v9 }
 0x92b   : > { %v1779_v63 = vpop.f32.mrf.mxu1 }
 0x92c   : > { %v1780_v0 = vadd.f32 %v1779_v63, %v1709_v62 }
 0x92d   : > { %v2835_v1 = vpop.f32.mrf.mxu1 }
 0x92e   : > { %2979 = vtanh.f32 %v1780_v0 }
 0x93b   : > { %v2980_v2 = vpop.eup %2979 }
 0x93c   : > { %2853 = vmatmul.mubr.msk.f32.vlgmr.msra.gmra.mxu0 %vm353_vm1, %v2980_v2 }
 0x93d   : > { %2875 = vmatpush3.msra.mxu0 %v3545_v26  ;;  %2890 = vmatprep.mubr.msk.f32.mxu0 %vm3018_vm0, %v3017_v9 }
 0x93e   : > { %2876 = vmatprep.subr.mxu0 %v3017_v9 }
 0x93f   : > { %2877 = vmatpush3.msra.mxu0 %v3551_v27 }
 0x940   : > { %2878 = vmatprep.subr.mxu0 %v3017_v9 }
 0x941   : > { %2879 = vmatpush3.msra.mxu0 %v3562_v28 }
 0x942   : > { %2880 = vmatprep.subr.mxu0 %v3017_v9 }
 0x943   : > { %2881 = vmatpush3.msra.mxu0 %v3571_v29 }
 0x944   : > { %2882 = vmatprep.subr.mxu0 %v3017_v9 }
 0x945   : > { %2883 = vmatpush3.msra.mxu0 %v3580_v30 }
 0x946   : > { %2884 = vmatprep.subr.mxu0 %v3017_v9 }
 0x947   : > { %2885 = vmatpush3.msra.mxu0 %v3587_v31 }
 0x948   : > { %2886 = vmatprep.subr.mxu0 %v3017_v9 }
 0x949   : > { %2887 = vmatpush3.msra.mxu0 %v3594_v32 }
 0x94a   : > { %2888 = vmatprep.subr.mxu0 %v3017_v9 }
 0x94b   : > { %2889 = vmatpush3.msra.mxu0 %v3603_v33 }
 0x94c   : > { %2912 = vmatprep.subr.mxu0 %v3017_v9 }
 0x9fc   : > { %v1854_v4 = vpop.f32.mrf.mxu0 }
 0x9fd   : > { %v1855_v5 = vadd.f32 %v1854_v4, %v1784_v3 }
 0x9fe   : > { %v2854_v6 = vpop.f32.mrf.mxu0 }
 0x9ff   : > { %2981 = vtanh.f32 %v1855_v5 }
 0xa0c   : > { %v2982_v7 = vpop.eup %2981 }
 0xa0d   : > { %2872 = vmatmul.mubr.msk.f32.vlgmr.msra.gmra.mxu1 %vm353_vm1, %v2982_v7 }
 0xa0e   : > { %2894 = vmatpush3.msra.mxu1 %v3545_v26  ;;  %2909 = vmatprep.mubr.msk.f32.mxu1 %vm3018_vm0, %v3017_v9  ;;  %v2084_v26 = vld [vmem:[%s3791_s5] sm:$0xff] }
 0xa0f   : > { %2895 = vmatprep.subr.mxu1 %v3017_v9 }
 0xa10   : > { %2896 = vmatpush3.msra.mxu1 %v3551_v27  ;;  %v2009_v27 = vld [vmem:[#allocation3 + $0x38] sm:$0xff] }
 0xa11   : > { %2897 = vmatprep.subr.mxu1 %v3017_v9 }
 0xa12   : > { %2898 = vmatpush3.msra.mxu1 %v3562_v28 }
 0xa13   : > { %2899 = vmatprep.subr.mxu1 %v3017_v9 }
 0xa14   : > { %2900 = vmatpush3.msra.mxu1 %v3571_v29 }
 0xa15   : > { %2901 = vmatprep.subr.mxu1 %v3017_v9 }
 0xa16   : > { %2902 = vmatpush3.msra.mxu1 %v3580_v30 }
 0xa17   : > { %2903 = vmatprep.subr.mxu1 %v3017_v9 }
 0xa18   : > { %2904 = vmatpush3.msra.mxu1 %v3587_v31 }
 0xa19   : > { %2905 = vmatprep.subr.mxu1 %v3017_v9 }
 0xa1a   : > { %2906 = vmatpush3.msra.mxu1 %v3594_v32  ;;  %v2283_v32 = vld [vmem:[%s3792_s6] ss:$0 sm:$0xff] }
 0xa1b   : > { %2907 = vmatprep.subr.mxu1 %v3017_v9 }
 0xa1c   : > { %2908 = vmatpush3.msra.mxu1 %v3603_v33 }
 0xacd   : > { %v1929_v10 = vpop.f32.mrf.mxu1 }
 0xace   : > { %v1930_v11 = vadd.f32 %v1929_v10, %v1859_v8 }
 0xacf   : > { %v2873_v12 = vpop.f32.mrf.mxu1 }
 0xad0   : > { %2983 = vtanh.f32 %v1930_v11 }
 0xadd   : > { %v2984_v13 = vpop.eup %2983 }
 0xade   : > { %2891 = vmatmul.mubr.msk.f32.vlgmr.msra.gmra.mxu0 %vm353_vm1, %v2984_v13 }
 0xadf   : > { %2928 = vmatprep.mubr.msk.f32.mxu0 %vm3018_vm0, %v3017_v9  ;;  %2913 = vmatpush3.msra.mxu0 %v2091_v19 }
 0xae0   : > { %2914 = vmatprep.subr.mxu0 %v3017_v9 }
 0xae1   : > { %2915 = vmatpush3.msra.mxu0 %v2090_v20 }
 0xae2   : > { %2916 = vmatprep.subr.mxu0 %v3017_v9 }
 0xae3   : > { %2917 = vmatpush3.msra.mxu0 %v2089_v21 }
 0xae4   : > { %2918 = vmatprep.subr.mxu0 %v3017_v9 }
 0xae5   : > { %2919 = vmatpush3.msra.mxu0 %v2088_v22 }
 0xae6   : > { %2920 = vmatprep.subr.mxu0 %v3017_v9 }
 0xae7   : > { %2921 = vmatpush3.msra.mxu0 %v2087_v23 }
 0xae8   : > { %2922 = vmatprep.subr.mxu0 %v3017_v9 }
 0xae9   : > { %2923 = vmatpush3.msra.mxu0 %v2086_v24 }
 0xaea   : > { %2924 = vmatprep.subr.mxu0 %v3017_v9 }
 0xaeb   : > { %2925 = vmatpush3.msra.mxu0 %v2085_v25 }
 0xaec   : > { %2926 = vmatprep.subr.mxu0 %v3017_v9 }
 0xaed   : > { %2927 = vmatpush3.msra.mxu0 %v2084_v26 }
 0xb9e   : > { %v2004_v15 = vpop.f32.mrf.mxu0 }
 0xb9f   : > { %v2005_v16 = vadd.f32 %v2004_v15, %v1934_v14 }
 0xba0   : > { %v2892_v17 = vpop.f32.mrf.mxu0 }
 0xba1   : > { %2985 = vtanh.f32 %v2005_v16 }
 0xbae   : > { %v2986_v18 = vpop.eup %2985 }
 0xbaf   : > { %2910 = vmatmul.mubr.msk.f32.vlgmr.msra.gmra.mxu1 %vm353_vm1, %v2986_v18 }
 0xc6f   : > { %v2079_v28 = vpop.f32.mrf.mxu1 }
 0xc70   : > { %v2080_v29 = vadd.f32 %v2079_v28, %v2009_v27 }
 0xc71   : > { %v2911_v30 = vpop.f32.mrf.mxu1 }
 0xc72   : > { %2987 = vtanh.f32 %v2080_v29 }
 0xc7f   : > { %v2988_v31 = vpop.eup %2987 }
 0xc80   : > { %2929 = vmatmul.mubr.msk.f32.vlgmr.msra.gmra.mxu0 %vm353_vm1, %v2988_v31 }
 0xd40   : > { %v2168_v33 = vpop.f32.mrf.mxu0 }
 0xd41   : > { %v2169_v34 = vadd.f32 %v2283_v32, %v2168_v33 }
 0xd42   : > { %v2930_v35 = vpop.f32.mrf.mxu0 }
 0xd43   : > { %v2173_v9 = vsel %vm2172_vm5, %v2169_v34, -inf }
 0xd44   : > { %2174 = vmax.xlane.f32.xlu0 %v2173_v9 }
 0xdcd   : > { %v2175_v36 = vpop.xlane.xlu0 %2174 }
 0xdce   : > { %v2176_v37 = vsub.f32 %v2169_v34, %v2175_v36 }
 0xdd0   : > { %v2177_v38 = vmul.f32 1.442695, %v2176_v37 }
 0xdd2   : > { %2989 = vpow2.f32 %v2177_v38 }
 0xddf   : > { %v2990_v39 = vpop.eup %2989 }
 0xde0   : > { %v2179_v40 = vsel %vm2172_vm5, %v2990_v39, 0.0 }
 0xde1   : > { %2180 = vadd.xlane.f32.xlu0 %v2179_v40 }
 0xe6a   : > { %v2181_v41 = vpop.xlane.xlu0 %2180 }
 0xe6b   : > { %2991 = vrcp.f32 %v2181_v41 }
 0xe78   : > { %v2992_v42 = vpop.eup %2991 }
 0xe79   : > { %v2183_v43 = vmul.f32 %v2992_v42, %v2990_v39 }
 0xe7b   : > { %2184 = vst.msk [vmem:[%s339_s18] sm:$0xff] %vm2172_vm5, %v2183_v43 }
 0xe7c PF: > { %p14_p9 = scmp.ge.s32.totalorder %s3076_s28, 4   ;;  %s3794_s24 = smov %s3011_s25 }
 0xe7d   : > { %s3795_s25 = smov %s3085_s8  ;;  %s3796_s26 = smov %s3076_s28 }
 0xe7e   :  { %16 = sbr.rel (!%p14_p9) target bundleno = 2 (0x2), region = 142 }

</bundles_post_ra>
